<compile_context>
chip_gen: v6e
topology: v6e:2x2x1
jax: 0.10.0
libtpu: 0.0.40
codegen_flags: <defaults>
</compile_context>

<pallas_src>
import functools

import jax
import jax.numpy as jnp
from jax.experimental import pallas as pl
from jax.experimental.pallas import tpu as pltpu


# ----------------------------------------------------------------------------
# Fused Pallas kernel: n_layers x LSTM + Linear head, single invocation.
# ----------------------------------------------------------------------------
def _make_fused_kernel(n_layers, n_hidden, seq_len, batch):
    H, T, B = n_hidden, seq_len, batch

    def kernel(*refs):
        it = iter(refs)
        x_ref = next(it)                                          # (B, T, I0)
        layer_refs = [(next(it), next(it), next(it)) for _ in range(n_layers)]
        fcw_ref = next(it)                                        # (H, V)
        fcb_ref = next(it)                                        # (1, V)
        h0_ref = next(it)                                         # (L, B, H)
        c0_ref = next(it)                                         # (L, B, H)
        out_ref = next(it)                                        # (B*T, V)
        hn_ref = next(it)                                         # (L, B, H)
        cn_ref = next(it)                                         # (L, B, H)

        cur = x_ref[...]                                          # batch_first (B, T, I)
        h_finals, c_finals = [], []
        for layer in range(n_layers):
            wih_ref, whh_ref, b_ref = layer_refs[layer]
            in_size = cur.shape[-1]

            # Hoisted input projection: one batched matmul per layer.
            gx = jnp.dot(cur.reshape(B * T, in_size), wih_ref[...],
                         preferred_element_type=jnp.float32)      # (B*T, 4H)
            gx = gx.reshape(B, T, 4 * H)

            whh = whh_ref[...]                                    # (H, 4H)
            bias = b_ref[...]                                     # (1, 4H)
            h = h0_ref[layer]                                     # (B, H)
            c = c0_ref[layer]                                     # (B, H)
            ys = []
            for t in range(T):                                    # static unroll
                g = (gx[:, t, :]
                     + jnp.dot(h, whh, preferred_element_type=jnp.float32)
                     + bias)                                      # (B, 4H), PyTorch order i,f,g,o
                sg = jax.nn.sigmoid(g)                            # whole-vreg EUP
                tg = jnp.tanh(g)                                  # whole-vreg EUP
                i_g = sg[:, 0 * H:1 * H]
                f_g = sg[:, 1 * H:2 * H]
                g_g = tg[:, 2 * H:3 * H]
                o_g = sg[:, 3 * H:4 * H]
                c = f_g * c + i_g * g_g
                h = o_g * jnp.tanh(c)
                ys.append(h)
            h_finals.append(h)
            c_finals.append(c)
            cur = jnp.stack(ys, axis=1)                           # (B, T, H), batch_first
            # TODO(synk): train-mode inter-layer dropout would apply here (identity in eval).

        out_flat = cur.reshape(B * T, H)
        out_ref[...] = (jnp.dot(out_flat, fcw_ref[...],
                                preferred_element_type=jnp.float32) + fcb_ref[...])
        hn_ref[...] = jnp.stack(h_finals, axis=0)
        cn_ref[...] = jnp.stack(c_finals, axis=0)

    return kernel


def _full_spec(shape):
    # Full-array block (grid=(1,)); last two block dims equal full array dims,
    # which satisfies the TPU (8,128) tiling rule at these small shapes.
    return pl.BlockSpec(shape, lambda i: (0,) * len(shape))


def prepare_params(params, n_layers):
    """One-time preprocessing (call OUTSIDE jit): transpose weights, sum biases."""
    flat = []
    for layer in range(n_layers):
        flat.append(jnp.transpose(params[f"w_ih_l{layer}"]))       # (I, 4H)
        flat.append(jnp.transpose(params[f"w_hh_l{layer}"]))       # (H, 4H)
        flat.append((params[f"b_ih_l{layer}"]
                     + params[f"b_hh_l{layer}"]).reshape(1, -1))   # (1, 4H)
    flat.append(jnp.transpose(params["fc_w"]))                     # (H, V)
    flat.append(params["fc_b"].reshape(1, -1))                     # (1, V)
    return tuple(flat)


@functools.partial(jax.jit, static_argnames=("n_layers", "n_hidden"))
def character_level_lstm_forward(x_btv, h0, c0, prepared, *, n_layers, n_hidden):
    """Mirrors CharacterLevelLSTM.forward (eval-mode dropout).

    x_btv:    (B, T, V) batch_first one-hot input.
    h0, c0:   (n_layers, B, H) initial state.
    prepared: tuple from prepare_params().
    Returns   out (B*T, V), (h_n, c_n) each (n_layers, B, H).
    """
    B, T, _ = x_btv.shape
    H = n_hidden
    V = prepared[-1].shape[-1]

    kernel = _make_fused_kernel(n_layers, H, T, B)
    inputs = (x_btv,) + tuple(prepared) + (h0, c0)

    out, h_n, c_n = pl.pallas_call(
        kernel,
        out_shape=(jax.ShapeDtypeStruct((B * T, V), jnp.float32),
                   jax.ShapeDtypeStruct((n_layers, B, H), jnp.float32),
                   jax.ShapeDtypeStruct((n_layers, B, H), jnp.float32)),
        grid=(1,),
        in_specs=[_full_spec(a.shape) for a in inputs],
        out_specs=(_full_spec((B * T, V)),
                   _full_spec((n_layers, B, H)),
                   _full_spec((n_layers, B, H))),
        compiler_params=pltpu.CompilerParams(
            dimension_semantics=("arbitrary",)),
    )(*inputs)
    return out, (h_n, c_n)


# ----------------------------------------------------------------------------
# Pure-JAX reference (for correctness check)
# ----------------------------------------------------------------------------
def _lstm_ref(x_btv, h0, c0, params, n_layers, n_hidden):
    B, T, V = x_btv.shape
    layer_in = x_btv
    h_fin, c_fin = [], []
    for layer in range(n_layers):
        w_ih = params[f"w_ih_l{layer}"]
        w_hh = params[f"w_hh_l{layer}"]
        b = params[f"b_ih_l{layer}"] + params[f"b_hh_l{layer}"]
        h = h0[layer]
        c = c0[layer]
        ys = []
        for t in range(T):
            g = layer_in[:, t, :] @ w_ih.T + h @ w_hh.T + b
            H = n_hidden
            i = jax.nn.sigmoid(g[:, 0*H:1*H]); f = jax.nn.sigmoid(g[:, 1*H:2*H])
            gg = jnp.tanh(g[:, 2*H:3*H]); o = jax.nn.sigmoid(g[:, 3*H:4*H])
            c = f * c + i * gg
            h = o * jnp.tanh(c)
            ys.append(h)
        layer_in = jnp.stack(ys, axis=1)
        h_fin.append(h); c_fin.append(c)
    out = layer_in.reshape(-1, n_hidden) @ params["fc_w"].T + params["fc_b"]
    return out, (jnp.stack(h_fin), jnp.stack(c_fin))


# ----------------------------------------------------------------------------
# Main
# ----------------------------------------------------------------------------
if __name__ == "__main__":
    n_hidden = 32
    n_layers = 2
    vocab_size = 16
    batch = 2
    seq = 8

    key = jax.random.PRNGKey(0)
    k = 1.0 / jnp.sqrt(n_hidden)

    params = {}
    for layer in range(n_layers):
        in_size = vocab_size if layer == 0 else n_hidden
        key, k1, k2, k3, k4 = jax.random.split(key, 5)
        params[f"w_ih_l{layer}"] = jax.random.uniform(
            k1, (4 * n_hidden, in_size), jnp.float32, -k, k)
        params[f"w_hh_l{layer}"] = jax.random.uniform(
            k2, (4 * n_hidden, n_hidden), jnp.float32, -k, k)
        params[f"b_ih_l{layer}"] = jax.random.uniform(
            k3, (4 * n_hidden,), jnp.float32, -k, k)
        params[f"b_hh_l{layer}"] = jax.random.uniform(
            k4, (4 * n_hidden,), jnp.float32, -k, k)
    key, kfw, kfb, kx = jax.random.split(key, 4)
    params["fc_w"] = jax.random.uniform(
        kfw, (vocab_size, n_hidden), jnp.float32, -k, k)
    params["fc_b"] = jax.random.uniform(
        kfb, (vocab_size,), jnp.float32, -k, k)

    # one-hot character input, batch_first (B, T, V)
    chars = jax.random.randint(kx, (batch, seq), 0, vocab_size)
    x = jax.nn.one_hot(chars, vocab_size, dtype=jnp.float32)

    # init_hidden_state equivalent: zeros (n_layers, B, H)
    h0 = jnp.zeros((n_layers, batch, n_hidden), jnp.float32)
    c0 = jnp.zeros((n_layers, batch, n_hidden), jnp.float32)

    prepared = prepare_params(params, n_layers)   # once, outside jit

    out, (h_n, c_n) = character_level_lstm_forward(
        x, h0, c0, prepared, n_layers=n_layers, n_hidden=n_hidden)
    jax.block_until_ready(out)
    jax.block_until_ready(h_n)
    jax.block_until_ready(c_n)

    out_ref, (h_ref, c_ref) = _lstm_ref(x, h0, c0, params, n_layers, n_hidden)
    assert out.shape == (batch * seq, vocab_size)
    assert h_n.shape == (n_layers, batch, n_hidden)
    assert c_n.shape == (n_layers, batch, n_hidden)
    assert jnp.allclose(out, out_ref, atol=1e-4), "fc output mismatch"
    assert jnp.allclose(h_n, h_ref, atol=1e-4), "h_n mismatch"
    assert jnp.allclose(c_n, c_ref, atol=1e-4), "c_n mismatch"

    print("KERNEL_OK")
</pallas_src>

<mosaic_0001>
module attributes {stable_mosaic.version = 11 : i64} {
  func.func @kernel(%arg0: i32, %arg1: memref<2x8x16xf32, #tpu.memory_space<vmem>>, %arg2: memref<16x128xf32, #tpu.memory_space<vmem>>, %arg3: memref<32x128xf32, #tpu.memory_space<vmem>>, %arg4: memref<1x128xf32, #tpu.memory_space<vmem>>, %arg5: memref<32x128xf32, #tpu.memory_space<vmem>>, %arg6: memref<32x128xf32, #tpu.memory_space<vmem>>, %arg7: memref<1x128xf32, #tpu.memory_space<vmem>>, %arg8: memref<32x16xf32, #tpu.memory_space<vmem>>, %arg9: memref<1x16xf32, #tpu.memory_space<vmem>>, %arg10: memref<2x2x32xf32, #tpu.memory_space<vmem>>, %arg11: memref<2x2x32xf32, #tpu.memory_space<vmem>>, %arg12: memref<16x16xf32, #tpu.memory_space<vmem>>, %arg13: memref<2x2x32xf32, #tpu.memory_space<vmem>>, %arg14: memref<2x2x32xf32, #tpu.memory_space<vmem>>) attributes {dimension_semantics = [#tpu.dimension_semantics<arbitrary>], iteration_bounds = array<i64: 1>, scalar_prefetch = 0 : i64, scratch_operands = 0 : i64, tpu.core_type = #tpu.core_type<tc>, window_params = [{pipeline_mode = #tpu.pipeline_mode<synchronous>, transform_indices = @transform_0, window_bounds = array<i64: 2, 8, 16>}, {pipeline_mode = #tpu.pipeline_mode<synchronous>, transform_indices = @transform_1, window_bounds = array<i64: 16, 128>}, {pipeline_mode = #tpu.pipeline_mode<synchronous>, transform_indices = @transform_2, window_bounds = array<i64: 32, 128>}, {pipeline_mode = #tpu.pipeline_mode<synchronous>, transform_indices = @transform_3, window_bounds = array<i64: 1, 128>}, {pipeline_mode = #tpu.pipeline_mode<synchronous>, transform_indices = @transform_4, window_bounds = array<i64: 32, 128>}, {pipeline_mode = #tpu.pipeline_mode<synchronous>, transform_indices = @transform_5, window_bounds = array<i64: 32, 128>}, {pipeline_mode = #tpu.pipeline_mode<synchronous>, transform_indices = @transform_6, window_bounds = array<i64: 1, 128>}, {pipeline_mode = #tpu.pipeline_mode<synchronous>, transform_indices = @transform_7, window_bounds = array<i64: 32, 16>}, {pipeline_mode = #tpu.pipeline_mode<synchronous>, transform_indices = @transform_8, window_bounds = array<i64: 1, 16>}, {pipeline_mode = #tpu.pipeline_mode<synchronous>, transform_indices = @transform_9, window_bounds = array<i64: 2, 2, 32>}, {pipeline_mode = #tpu.pipeline_mode<synchronous>, transform_indices = @transform_10, window_bounds = array<i64: 2, 2, 32>}, {pipeline_mode = #tpu.pipeline_mode<synchronous>, transform_indices = @transform_11, window_bounds = array<i64: 16, 16>}, {pipeline_mode = #tpu.pipeline_mode<synchronous>, transform_indices = @transform_12, window_bounds = array<i64: 2, 2, 32>}, {pipeline_mode = #tpu.pipeline_mode<synchronous>, transform_indices = @transform_13, window_bounds = array<i64: 2, 2, 32>}]} {
    %c0 = arith.constant 0 : index
    %c0_0 = arith.constant 0 : index
    %c0_1 = arith.constant 0 : index
    %0 = vector.load %arg1[%c0, %c0_0, %c0_1] : memref<2x8x16xf32, #tpu.memory_space<vmem>>, vector<2x8x16xf32>
    %1 = vector.shape_cast %0 : vector<2x8x16xf32> to vector<16x16xf32>
    %c0_2 = arith.constant 0 : index
    %c0_3 = arith.constant 0 : index
    %2 = vector.load %arg2[%c0_2, %c0_3] : memref<16x128xf32, #tpu.memory_space<vmem>>, vector<16x128xf32>
    %cst = arith.constant dense<0.000000e+00> : vector<16x128xf32>
    %3 = tpu.matmul %1, %2, %cst {dimension_numbers = #tpu.dot_dimension_numbers<[1], [0], [0], [1], [0, 0, 1, 1], [], []>} : vector<16x16xf32>, vector<16x128xf32>, vector<16x128xf32> -> vector<16x128xf32>
    %4 = vector.shape_cast %3 : vector<16x128xf32> to vector<2x8x128xf32>
    %c0_4 = arith.constant 0 : index
    %c0_5 = arith.constant 0 : index
    %5 = vector.load %arg3[%c0_4, %c0_5] : memref<32x128xf32, #tpu.memory_space<vmem>>, vector<32x128xf32>
    %c0_6 = arith.constant 0 : index
    %c0_7 = arith.constant 0 : index
    %6 = vector.load %arg4[%c0_6, %c0_7] : memref<1x128xf32, #tpu.memory_space<vmem>>, vector<1x128xf32>
    %c0_8 = arith.constant 0 : index
    %c0_9 = arith.constant 0 : index
    %c0_10 = arith.constant 0 : index
    %7 = vector.load %arg10[%c0_8, %c0_9, %c0_10] : memref<2x2x32xf32, #tpu.memory_space<vmem>>, vector<1x2x32xf32>
    %8 = vector.shape_cast %7 : vector<1x2x32xf32> to vector<2x32xf32>
    %c0_11 = arith.constant 0 : index
    %c0_12 = arith.constant 0 : index
    %c0_13 = arith.constant 0 : index
    %9 = vector.load %arg11[%c0_11, %c0_12, %c0_13] : memref<2x2x32xf32, #tpu.memory_space<vmem>>, vector<1x2x32xf32>
    %10 = vector.shape_cast %9 : vector<1x2x32xf32> to vector<2x32xf32>
    %11 = vector.extract_strided_slice %4 {offsets = [0, 0, 0], sizes = [2, 1, 128], strides = [1, 1, 1]} : vector<2x8x128xf32> to vector<2x1x128xf32>
    %12 = vector.shape_cast %11 : vector<2x1x128xf32> to vector<2x128xf32>
    %cst_14 = arith.constant dense<0.000000e+00> : vector<2x128xf32>
    %13 = tpu.matmul %8, %5, %cst_14 {dimension_numbers = #tpu.dot_dimension_numbers<[1], [0], [0], [1], [0, 0, 1, 1], [], []>} : vector<2x32xf32>, vector<32x128xf32>, vector<2x128xf32> -> vector<2x128xf32>
    %14 = arith.addf %12, %13 : vector<2x128xf32>
    %15 = vector.broadcast %6 : vector<1x128xf32> to vector<2x128xf32>
    %16 = arith.addf %14, %15 : vector<2x128xf32>
    %17 = arith.negf %16 : vector<2x128xf32>
    %18 = math.exp %17 : vector<2x128xf32>
    %cst_15 = arith.constant 1.000000e+00 : f32
    %19 = vector.broadcast %cst_15 : f32 to vector<2x128xf32>
    %20 = arith.addf %19, %18 : vector<2x128xf32>
    %21 = arith.divf %19, %20 : vector<2x128xf32>
    %22 = math.tanh %16 : vector<2x128xf32>
    %23 = vector.extract_strided_slice %21 {offsets = [0, 0], sizes = [2, 32], strides = [1, 1]} : vector<2x128xf32> to vector<2x32xf32>
    %24 = vector.extract_strided_slice %21 {offsets = [0, 32], sizes = [2, 32], strides = [1, 1]} : vector<2x128xf32> to vector<2x32xf32>
    %25 = vector.extract_strided_slice %22 {offsets = [0, 64], sizes = [2, 32], strides = [1, 1]} : vector<2x128xf32> to vector<2x32xf32>
    %26 = vector.extract_strided_slice %21 {offsets = [0, 96], sizes = [2, 32], strides = [1, 1]} : vector<2x128xf32> to vector<2x32xf32>
    %27 = arith.mulf %24, %10 : vector<2x32xf32>
    %28 = arith.mulf %23, %25 : vector<2x32xf32>
    %29 = arith.addf %27, %28 : vector<2x32xf32>
    %30 = math.tanh %29 : vector<2x32xf32>
    %31 = arith.mulf %26, %30 : vector<2x32xf32>
    %32 = vector.extract_strided_slice %4 {offsets = [0, 1, 0], sizes = [2, 1, 128], strides = [1, 1, 1]} : vector<2x8x128xf32> to vector<2x1x128xf32>
    %33 = vector.shape_cast %32 : vector<2x1x128xf32> to vector<2x128xf32>
    %cst_16 = arith.constant dense<0.000000e+00> : vector<2x128xf32>
    %34 = tpu.matmul %31, %5, %cst_16 {dimension_numbers = #tpu.dot_dimension_numbers<[1], [0], [0], [1], [0, 0, 1, 1], [], []>} : vector<2x32xf32>, vector<32x128xf32>, vector<2x128xf32> -> vector<2x128xf32>
    %35 = arith.addf %33, %34 : vector<2x128xf32>
    %36 = vector.broadcast %6 : vector<1x128xf32> to vector<2x128xf32>
    %37 = arith.addf %35, %36 : vector<2x128xf32>
    %38 = arith.negf %37 : vector<2x128xf32>
    %39 = math.exp %38 : vector<2x128xf32>
    %cst_17 = arith.constant 1.000000e+00 : f32
    %40 = vector.broadcast %cst_17 : f32 to vector<2x128xf32>
    %41 = arith.addf %40, %39 : vector<2x128xf32>
    %42 = arith.divf %40, %41 : vector<2x128xf32>
    %43 = math.tanh %37 : vector<2x128xf32>
    %44 = vector.extract_strided_slice %42 {offsets = [0, 0], sizes = [2, 32], strides = [1, 1]} : vector<2x128xf32> to vector<2x32xf32>
    %45 = vector.extract_strided_slice %42 {offsets = [0, 32], sizes = [2, 32], strides = [1, 1]} : vector<2x128xf32> to vector<2x32xf32>
    %46 = vector.extract_strided_slice %43 {offsets = [0, 64], sizes = [2, 32], strides = [1, 1]} : vector<2x128xf32> to vector<2x32xf32>
    %47 = vector.extract_strided_slice %42 {offsets = [0, 96], sizes = [2, 32], strides = [1, 1]} : vector<2x128xf32> to vector<2x32xf32>
    %48 = arith.mulf %45, %29 : vector<2x32xf32>
    %49 = arith.mulf %44, %46 : vector<2x32xf32>
    %50 = arith.addf %48, %49 : vector<2x32xf32>
    %51 = math.tanh %50 : vector<2x32xf32>
    %52 = arith.mulf %47, %51 : vector<2x32xf32>
    %53 = vector.extract_strided_slice %4 {offsets = [0, 2, 0], sizes = [2, 1, 128], strides = [1, 1, 1]} : vector<2x8x128xf32> to vector<2x1x128xf32>
    %54 = vector.shape_cast %53 : vector<2x1x128xf32> to vector<2x128xf32>
    %cst_18 = arith.constant dense<0.000000e+00> : vector<2x128xf32>
    %55 = tpu.matmul %52, %5, %cst_18 {dimension_numbers = #tpu.dot_dimension_numbers<[1], [0], [0], [1], [0, 0, 1, 1], [], []>} : vector<2x32xf32>, vector<32x128xf32>, vector<2x128xf32> -> vector<2x128xf32>
    %56 = arith.addf %54, %55 : vector<2x128xf32>
    %57 = vector.broadcast %6 : vector<1x128xf32> to vector<2x128xf32>
    %58 = arith.addf %56, %57 : vector<2x128xf32>
    %59 = arith.negf %58 : vector<2x128xf32>
    %60 = math.exp %59 : vector<2x128xf32>
    %cst_19 = arith.constant 1.000000e+00 : f32
    %61 = vector.broadcast %cst_19 : f32 to vector<2x128xf32>
    %62 = arith.addf %61, %60 : vector<2x128xf32>
    %63 = arith.divf %61, %62 : vector<2x128xf32>
    %64 = math.tanh %58 : vector<2x128xf32>
    %65 = vector.extract_strided_slice %63 {offsets = [0, 0], sizes = [2, 32], strides = [1, 1]} : vector<2x128xf32> to vector<2x32xf32>
    %66 = vector.extract_strided_slice %63 {offsets = [0, 32], sizes = [2, 32], strides = [1, 1]} : vector<2x128xf32> to vector<2x32xf32>
    %67 = vector.extract_strided_slice %64 {offsets = [0, 64], sizes = [2, 32], strides = [1, 1]} : vector<2x128xf32> to vector<2x32xf32>
    %68 = vector.extract_strided_slice %63 {offsets = [0, 96], sizes = [2, 32], strides = [1, 1]} : vector<2x128xf32> to vector<2x32xf32>
    %69 = arith.mulf %66, %50 : vector<2x32xf32>
    %70 = arith.mulf %65, %67 : vector<2x32xf32>
    %71 = arith.addf %69, %70 : vector<2x32xf32>
    %72 = math.tanh %71 : vector<2x32xf32>
    %73 = arith.mulf %68, %72 : vector<2x32xf32>
    %74 = vector.extract_strided_slice %4 {offsets = [0, 3, 0], sizes = [2, 1, 128], strides = [1, 1, 1]} : vector<2x8x128xf32> to vector<2x1x128xf32>
    %75 = vector.shape_cast %74 : vector<2x1x128xf32> to vector<2x128xf32>
    %cst_20 = arith.constant dense<0.000000e+00> : vector<2x128xf32>
    %76 = tpu.matmul %73, %5, %cst_20 {dimension_numbers = #tpu.dot_dimension_numbers<[1], [0], [0], [1], [0, 0, 1, 1], [], []>} : vector<2x32xf32>, vector<32x128xf32>, vector<2x128xf32> -> vector<2x128xf32>
    %77 = arith.addf %75, %76 : vector<2x128xf32>
    %78 = vector.broadcast %6 : vector<1x128xf32> to vector<2x128xf32>
    %79 = arith.addf %77, %78 : vector<2x128xf32>
    %80 = arith.negf %79 : vector<2x128xf32>
    %81 = math.exp %80 : vector<2x128xf32>
    %cst_21 = arith.constant 1.000000e+00 : f32
    %82 = vector.broadcast %cst_21 : f32 to vector<2x128xf32>
    %83 = arith.addf %82, %81 : vector<2x128xf32>
    %84 = arith.divf %82, %83 : vector<2x128xf32>
    %85 = math.tanh %79 : vector<2x128xf32>
    %86 = vector.extract_strided_slice %84 {offsets = [0, 0], sizes = [2, 32], strides = [1, 1]} : vector<2x128xf32> to vector<2x32xf32>
    %87 = vector.extract_strided_slice %84 {offsets = [0, 32], sizes = [2, 32], strides = [1, 1]} : vector<2x128xf32> to vector<2x32xf32>
    %88 = vector.extract_strided_slice %85 {offsets = [0, 64], sizes = [2, 32], strides = [1, 1]} : vector<2x128xf32> to vector<2x32xf32>
    %89 = vector.extract_strided_slice %84 {offsets = [0, 96], sizes = [2, 32], strides = [1, 1]} : vector<2x128xf32> to vector<2x32xf32>
    %90 = arith.mulf %87, %71 : vector<2x32xf32>
    %91 = arith.mulf %86, %88 : vector<2x32xf32>
    %92 = arith.addf %90, %91 : vector<2x32xf32>
    %93 = math.tanh %92 : vector<2x32xf32>
    %94 = arith.mulf %89, %93 : vector<2x32xf32>
    %95 = vector.extract_strided_slice %4 {offsets = [0, 4, 0], sizes = [2, 1, 128], strides = [1, 1, 1]} : vector<2x8x128xf32> to vector<2x1x128xf32>
    %96 = vector.shape_cast %95 : vector<2x1x128xf32> to vector<2x128xf32>
    %cst_22 = arith.constant dense<0.000000e+00> : vector<2x128xf32>
    %97 = tpu.matmul %94, %5, %cst_22 {dimension_numbers = #tpu.dot_dimension_numbers<[1], [0], [0], [1], [0, 0, 1, 1], [], []>} : vector<2x32xf32>, vector<32x128xf32>, vector<2x128xf32> -> vector<2x128xf32>
    %98 = arith.addf %96, %97 : vector<2x128xf32>
    %99 = vector.broadcast %6 : vector<1x128xf32> to vector<2x128xf32>
    %100 = arith.addf %98, %99 : vector<2x128xf32>
    %101 = arith.negf %100 : vector<2x128xf32>
    %102 = math.exp %101 : vector<2x128xf32>
    %cst_23 = arith.constant 1.000000e+00 : f32
    %103 = vector.broadcast %cst_23 : f32 to vector<2x128xf32>
    %104 = arith.addf %103, %102 : vector<2x128xf32>
    %105 = arith.divf %103, %104 : vector<2x128xf32>
    %106 = math.tanh %100 : vector<2x128xf32>
    %107 = vector.extract_strided_slice %105 {offsets = [0, 0], sizes = [2, 32], strides = [1, 1]} : vector<2x128xf32> to vector<2x32xf32>
    %108 = vector.extract_strided_slice %105 {offsets = [0, 32], sizes = [2, 32], strides = [1, 1]} : vector<2x128xf32> to vector<2x32xf32>
    %109 = vector.extract_strided_slice %106 {offsets = [0, 64], sizes = [2, 32], strides = [1, 1]} : vector<2x128xf32> to vector<2x32xf32>
    %110 = vector.extract_strided_slice %105 {offsets = [0, 96], sizes = [2, 32], strides = [1, 1]} : vector<2x128xf32> to vector<2x32xf32>
    %111 = arith.mulf %108, %92 : vector<2x32xf32>
    %112 = arith.mulf %107, %109 : vector<2x32xf32>
    %113 = arith.addf %111, %112 : vector<2x32xf32>
    %114 = math.tanh %113 : vector<2x32xf32>
    %115 = arith.mulf %110, %114 : vector<2x32xf32>
    %116 = vector.extract_strided_slice %4 {offsets = [0, 5, 0], sizes = [2, 1, 128], strides = [1, 1, 1]} : vector<2x8x128xf32> to vector<2x1x128xf32>
    %117 = vector.shape_cast %116 : vector<2x1x128xf32> to vector<2x128xf32>
    %cst_24 = arith.constant dense<0.000000e+00> : vector<2x128xf32>
    %118 = tpu.matmul %115, %5, %cst_24 {dimension_numbers = #tpu.dot_dimension_numbers<[1], [0], [0], [1], [0, 0, 1, 1], [], []>} : vector<2x32xf32>, vector<32x128xf32>, vector<2x128xf32> -> vector<2x128xf32>
    %119 = arith.addf %117, %118 : vector<2x128xf32>
    %120 = vector.broadcast %6 : vector<1x128xf32> to vector<2x128xf32>
    %121 = arith.addf %119, %120 : vector<2x128xf32>
    %122 = arith.negf %121 : vector<2x128xf32>
    %123 = math.exp %122 : vector<2x128xf32>
    %cst_25 = arith.constant 1.000000e+00 : f32
    %124 = vector.broadcast %cst_25 : f32 to vector<2x128xf32>
    %125 = arith.addf %124, %123 : vector<2x128xf32>
    %126 = arith.divf %124, %125 : vector<2x128xf32>
    %127 = math.tanh %121 : vector<2x128xf32>
    %128 = vector.extract_strided_slice %126 {offsets = [0, 0], sizes = [2, 32], strides = [1, 1]} : vector<2x128xf32> to vector<2x32xf32>
    %129 = vector.extract_strided_slice %126 {offsets = [0, 32], sizes = [2, 32], strides = [1, 1]} : vector<2x128xf32> to vector<2x32xf32>
    %130 = vector.extract_strided_slice %127 {offsets = [0, 64], sizes = [2, 32], strides = [1, 1]} : vector<2x128xf32> to vector<2x32xf32>
    %131 = vector.extract_strided_slice %126 {offsets = [0, 96], sizes = [2, 32], strides = [1, 1]} : vector<2x128xf32> to vector<2x32xf32>
    %132 = arith.mulf %129, %113 : vector<2x32xf32>
    %133 = arith.mulf %128, %130 : vector<2x32xf32>
    %134 = arith.addf %132, %133 : vector<2x32xf32>
    %135 = math.tanh %134 : vector<2x32xf32>
    %136 = arith.mulf %131, %135 : vector<2x32xf32>
    %137 = vector.extract_strided_slice %4 {offsets = [0, 6, 0], sizes = [2, 1, 128], strides = [1, 1, 1]} : vector<2x8x128xf32> to vector<2x1x128xf32>
    %138 = vector.shape_cast %137 : vector<2x1x128xf32> to vector<2x128xf32>
    %cst_26 = arith.constant dense<0.000000e+00> : vector<2x128xf32>
    %139 = tpu.matmul %136, %5, %cst_26 {dimension_numbers = #tpu.dot_dimension_numbers<[1], [0], [0], [1], [0, 0, 1, 1], [], []>} : vector<2x32xf32>, vector<32x128xf32>, vector<2x128xf32> -> vector<2x128xf32>
    %140 = arith.addf %138, %139 : vector<2x128xf32>
    %141 = vector.broadcast %6 : vector<1x128xf32> to vector<2x128xf32>
    %142 = arith.addf %140, %141 : vector<2x128xf32>
    %143 = arith.negf %142 : vector<2x128xf32>
    %144 = math.exp %143 : vector<2x128xf32>
    %cst_27 = arith.constant 1.000000e+00 : f32
    %145 = vector.broadcast %cst_27 : f32 to vector<2x128xf32>
    %146 = arith.addf %145, %144 : vector<2x128xf32>
    %147 = arith.divf %145, %146 : vector<2x128xf32>
    %148 = math.tanh %142 : vector<2x128xf32>
    %149 = vector.extract_strided_slice %147 {offsets = [0, 0], sizes = [2, 32], strides = [1, 1]} : vector<2x128xf32> to vector<2x32xf32>
    %150 = vector.extract_strided_slice %147 {offsets = [0, 32], sizes = [2, 32], strides = [1, 1]} : vector<2x128xf32> to vector<2x32xf32>
    %151 = vector.extract_strided_slice %148 {offsets = [0, 64], sizes = [2, 32], strides = [1, 1]} : vector<2x128xf32> to vector<2x32xf32>
    %152 = vector.extract_strided_slice %147 {offsets = [0, 96], sizes = [2, 32], strides = [1, 1]} : vector<2x128xf32> to vector<2x32xf32>
    %153 = arith.mulf %150, %134 : vector<2x32xf32>
    %154 = arith.mulf %149, %151 : vector<2x32xf32>
    %155 = arith.addf %153, %154 : vector<2x32xf32>
    %156 = math.tanh %155 : vector<2x32xf32>
    %157 = arith.mulf %152, %156 : vector<2x32xf32>
    %158 = vector.extract_strided_slice %4 {offsets = [0, 7, 0], sizes = [2, 1, 128], strides = [1, 1, 1]} : vector<2x8x128xf32> to vector<2x1x128xf32>
    %159 = vector.shape_cast %158 : vector<2x1x128xf32> to vector<2x128xf32>
    %cst_28 = arith.constant dense<0.000000e+00> : vector<2x128xf32>
    %160 = tpu.matmul %157, %5, %cst_28 {dimension_numbers = #tpu.dot_dimension_numbers<[1], [0], [0], [1], [0, 0, 1, 1], [], []>} : vector<2x32xf32>, vector<32x128xf32>, vector<2x128xf32> -> vector<2x128xf32>
    %161 = arith.addf %159, %160 : vector<2x128xf32>
    %162 = vector.broadcast %6 : vector<1x128xf32> to vector<2x128xf32>
    %163 = arith.addf %161, %162 : vector<2x128xf32>
    %164 = arith.negf %163 : vector<2x128xf32>
    %165 = math.exp %164 : vector<2x128xf32>
    %cst_29 = arith.constant 1.000000e+00 : f32
    %166 = vector.broadcast %cst_29 : f32 to vector<2x128xf32>
    %167 = arith.addf %166, %165 : vector<2x128xf32>
    %168 = arith.divf %166, %167 : vector<2x128xf32>
    %169 = math.tanh %163 : vector<2x128xf32>
    %170 = vector.extract_strided_slice %168 {offsets = [0, 0], sizes = [2, 32], strides = [1, 1]} : vector<2x128xf32> to vector<2x32xf32>
    %171 = vector.extract_strided_slice %168 {offsets = [0, 32], sizes = [2, 32], strides = [1, 1]} : vector<2x128xf32> to vector<2x32xf32>
    %172 = vector.extract_strided_slice %169 {offsets = [0, 64], sizes = [2, 32], strides = [1, 1]} : vector<2x128xf32> to vector<2x32xf32>
    %173 = vector.extract_strided_slice %168 {offsets = [0, 96], sizes = [2, 32], strides = [1, 1]} : vector<2x128xf32> to vector<2x32xf32>
    %174 = arith.mulf %171, %155 : vector<2x32xf32>
    %175 = arith.mulf %170, %172 : vector<2x32xf32>
    %176 = arith.addf %174, %175 : vector<2x32xf32>
    %177 = math.tanh %176 : vector<2x32xf32>
    %178 = arith.mulf %173, %177 : vector<2x32xf32>
    %179 = vector.shape_cast %31 : vector<2x32xf32> to vector<2x1x32xf32>
    %180 = vector.shape_cast %52 : vector<2x32xf32> to vector<2x1x32xf32>
    %181 = vector.shape_cast %73 : vector<2x32xf32> to vector<2x1x32xf32>
    %182 = vector.shape_cast %94 : vector<2x32xf32> to vector<2x1x32xf32>
    %183 = vector.shape_cast %115 : vector<2x32xf32> to vector<2x1x32xf32>
    %184 = vector.shape_cast %136 : vector<2x32xf32> to vector<2x1x32xf32>
    %185 = vector.shape_cast %157 : vector<2x32xf32> to vector<2x1x32xf32>
    %186 = vector.shape_cast %178 : vector<2x32xf32> to vector<2x1x32xf32>
    %187 = tpu.concatenate %179, %180, %181, %182, %183, %184, %185, %186 in 1 : vector<2x1x32xf32>, vector<2x1x32xf32>, vector<2x1x32xf32>, vector<2x1x32xf32>, vector<2x1x32xf32>, vector<2x1x32xf32>, vector<2x1x32xf32>, vector<2x1x32xf32> -> vector<2x8x32xf32>
    %188 = vector.shape_cast %187 : vector<2x8x32xf32> to vector<16x32xf32>
    %c0_30 = arith.constant 0 : index
    %c0_31 = arith.constant 0 : index
    %189 = vector.load %arg5[%c0_30, %c0_31] : memref<32x128xf32, #tpu.memory_space<vmem>>, vector<32x128xf32>
    %cst_32 = arith.constant dense<0.000000e+00> : vector<16x128xf32>
    %190 = tpu.matmul %188, %189, %cst_32 {dimension_numbers = #tpu.dot_dimension_numbers<[1], [0], [0], [1], [0, 0, 1, 1], [], []>} : vector<16x32xf32>, vector<32x128xf32>, vector<16x128xf32> -> vector<16x128xf32>
    %191 = vector.shape_cast %190 : vector<16x128xf32> to vector<2x8x128xf32>
    %c0_33 = arith.constant 0 : index
    %c0_34 = arith.constant 0 : index
    %192 = vector.load %arg6[%c0_33, %c0_34] : memref<32x128xf32, #tpu.memory_space<vmem>>, vector<32x128xf32>
    %c0_35 = arith.constant 0 : index
    %c0_36 = arith.constant 0 : index
    %193 = vector.load %arg7[%c0_35, %c0_36] : memref<1x128xf32, #tpu.memory_space<vmem>>, vector<1x128xf32>
    %c1 = arith.constant 1 : index
    %c0_37 = arith.constant 0 : index
    %c0_38 = arith.constant 0 : index
    %194 = vector.load %arg10[%c1, %c0_37, %c0_38] : memref<2x2x32xf32, #tpu.memory_space<vmem>>, vector<1x2x32xf32>
    %195 = vector.shape_cast %194 : vector<1x2x32xf32> to vector<2x32xf32>
    %c1_39 = arith.constant 1 : index
    %c0_40 = arith.constant 0 : index
    %c0_41 = arith.constant 0 : index
    %196 = vector.load %arg11[%c1_39, %c0_40, %c0_41] : memref<2x2x32xf32, #tpu.memory_space<vmem>>, vector<1x2x32xf32>
    %197 = vector.shape_cast %196 : vector<1x2x32xf32> to vector<2x32xf32>
    %198 = vector.extract_strided_slice %191 {offsets = [0, 0, 0], sizes = [2, 1, 128], strides = [1, 1, 1]} : vector<2x8x128xf32> to vector<2x1x128xf32>
    %199 = vector.shape_cast %198 : vector<2x1x128xf32> to vector<2x128xf32>
    %cst_42 = arith.constant dense<0.000000e+00> : vector<2x128xf32>
    %200 = tpu.matmul %195, %192, %cst_42 {dimension_numbers = #tpu.dot_dimension_numbers<[1], [0], [0], [1], [0, 0, 1, 1], [], []>} : vector<2x32xf32>, vector<32x128xf32>, vector<2x128xf32> -> vector<2x128xf32>
    %201 = arith.addf %199, %200 : vector<2x128xf32>
    %202 = vector.broadcast %193 : vector<1x128xf32> to vector<2x128xf32>
    %203 = arith.addf %201, %202 : vector<2x128xf32>
    %204 = arith.negf %203 : vector<2x128xf32>
    %205 = math.exp %204 : vector<2x128xf32>
    %cst_43 = arith.constant 1.000000e+00 : f32
    %206 = vector.broadcast %cst_43 : f32 to vector<2x128xf32>
    %207 = arith.addf %206, %205 : vector<2x128xf32>
    %208 = arith.divf %206, %207 : vector<2x128xf32>
    %209 = math.tanh %203 : vector<2x128xf32>
    %210 = vector.extract_strided_slice %208 {offsets = [0, 0], sizes = [2, 32], strides = [1, 1]} : vector<2x128xf32> to vector<2x32xf32>
    %211 = vector.extract_strided_slice %208 {offsets = [0, 32], sizes = [2, 32], strides = [1, 1]} : vector<2x128xf32> to vector<2x32xf32>
    %212 = vector.extract_strided_slice %209 {offsets = [0, 64], sizes = [2, 32], strides = [1, 1]} : vector<2x128xf32> to vector<2x32xf32>
    %213 = vector.extract_strided_slice %208 {offsets = [0, 96], sizes = [2, 32], strides = [1, 1]} : vector<2x128xf32> to vector<2x32xf32>
    %214 = arith.mulf %211, %197 : vector<2x32xf32>
    %215 = arith.mulf %210, %212 : vector<2x32xf32>
    %216 = arith.addf %214, %215 : vector<2x32xf32>
    %217 = math.tanh %216 : vector<2x32xf32>
    %218 = arith.mulf %213, %217 : vector<2x32xf32>
    %219 = vector.extract_strided_slice %191 {offsets = [0, 1, 0], sizes = [2, 1, 128], strides = [1, 1, 1]} : vector<2x8x128xf32> to vector<2x1x128xf32>
    %220 = vector.shape_cast %219 : vector<2x1x128xf32> to vector<2x128xf32>
    %cst_44 = arith.constant dense<0.000000e+00> : vector<2x128xf32>
    %221 = tpu.matmul %218, %192, %cst_44 {dimension_numbers = #tpu.dot_dimension_numbers<[1], [0], [0], [1], [0, 0, 1, 1], [], []>} : vector<2x32xf32>, vector<32x128xf32>, vector<2x128xf32> -> vector<2x128xf32>
    %222 = arith.addf %220, %221 : vector<2x128xf32>
    %223 = vector.broadcast %193 : vector<1x128xf32> to vector<2x128xf32>
    %224 = arith.addf %222, %223 : vector<2x128xf32>
    %225 = arith.negf %224 : vector<2x128xf32>
    %226 = math.exp %225 : vector<2x128xf32>
    %cst_45 = arith.constant 1.000000e+00 : f32
    %227 = vector.broadcast %cst_45 : f32 to vector<2x128xf32>
    %228 = arith.addf %227, %226 : vector<2x128xf32>
    %229 = arith.divf %227, %228 : vector<2x128xf32>
    %230 = math.tanh %224 : vector<2x128xf32>
    %231 = vector.extract_strided_slice %229 {offsets = [0, 0], sizes = [2, 32], strides = [1, 1]} : vector<2x128xf32> to vector<2x32xf32>
    %232 = vector.extract_strided_slice %229 {offsets = [0, 32], sizes = [2, 32], strides = [1, 1]} : vector<2x128xf32> to vector<2x32xf32>
    %233 = vector.extract_strided_slice %230 {offsets = [0, 64], sizes = [2, 32], strides = [1, 1]} : vector<2x128xf32> to vector<2x32xf32>
    %234 = vector.extract_strided_slice %229 {offsets = [0, 96], sizes = [2, 32], strides = [1, 1]} : vector<2x128xf32> to vector<2x32xf32>
    %235 = arith.mulf %232, %216 : vector<2x32xf32>
    %236 = arith.mulf %231, %233 : vector<2x32xf32>
    %237 = arith.addf %235, %236 : vector<2x32xf32>
    %238 = math.tanh %237 : vector<2x32xf32>
    %239 = arith.mulf %234, %238 : vector<2x32xf32>
    %240 = vector.extract_strided_slice %191 {offsets = [0, 2, 0], sizes = [2, 1, 128], strides = [1, 1, 1]} : vector<2x8x128xf32> to vector<2x1x128xf32>
    %241 = vector.shape_cast %240 : vector<2x1x128xf32> to vector<2x128xf32>
    %cst_46 = arith.constant dense<0.000000e+00> : vector<2x128xf32>
    %242 = tpu.matmul %239, %192, %cst_46 {dimension_numbers = #tpu.dot_dimension_numbers<[1], [0], [0], [1], [0, 0, 1, 1], [], []>} : vector<2x32xf32>, vector<32x128xf32>, vector<2x128xf32> -> vector<2x128xf32>
    %243 = arith.addf %241, %242 : vector<2x128xf32>
    %244 = vector.broadcast %193 : vector<1x128xf32> to vector<2x128xf32>
    %245 = arith.addf %243, %244 : vector<2x128xf32>
    %246 = arith.negf %245 : vector<2x128xf32>
    %247 = math.exp %246 : vector<2x128xf32>
    %cst_47 = arith.constant 1.000000e+00 : f32
    %248 = vector.broadcast %cst_47 : f32 to vector<2x128xf32>
    %249 = arith.addf %248, %247 : vector<2x128xf32>
    %250 = arith.divf %248, %249 : vector<2x128xf32>
    %251 = math.tanh %245 : vector<2x128xf32>
    %252 = vector.extract_strided_slice %250 {offsets = [0, 0], sizes = [2, 32], strides = [1, 1]} : vector<2x128xf32> to vector<2x32xf32>
    %253 = vector.extract_strided_slice %250 {offsets = [0, 32], sizes = [2, 32], strides = [1, 1]} : vector<2x128xf32> to vector<2x32xf32>
    %254 = vector.extract_strided_slice %251 {offsets = [0, 64], sizes = [2, 32], strides = [1, 1]} : vector<2x128xf32> to vector<2x32xf32>
    %255 = vector.extract_strided_slice %250 {offsets = [0, 96], sizes = [2, 32], strides = [1, 1]} : vector<2x128xf32> to vector<2x32xf32>
    %256 = arith.mulf %253, %237 : vector<2x32xf32>
    %257 = arith.mulf %252, %254 : vector<2x32xf32>
    %258 = arith.addf %256, %257 : vector<2x32xf32>
    %259 = math.tanh %258 : vector<2x32xf32>
    %260 = arith.mulf %255, %259 : vector<2x32xf32>
    %261 = vector.extract_strided_slice %191 {offsets = [0, 3, 0], sizes = [2, 1, 128], strides = [1, 1, 1]} : vector<2x8x128xf32> to vector<2x1x128xf32>
    %262 = vector.shape_cast %261 : vector<2x1x128xf32> to vector<2x128xf32>
    %cst_48 = arith.constant dense<0.000000e+00> : vector<2x128xf32>
    %263 = tpu.matmul %260, %192, %cst_48 {dimension_numbers = #tpu.dot_dimension_numbers<[1], [0], [0], [1], [0, 0, 1, 1], [], []>} : vector<2x32xf32>, vector<32x128xf32>, vector<2x128xf32> -> vector<2x128xf32>
    %264 = arith.addf %262, %263 : vector<2x128xf32>
    %265 = vector.broadcast %193 : vector<1x128xf32> to vector<2x128xf32>
    %266 = arith.addf %264, %265 : vector<2x128xf32>
    %267 = arith.negf %266 : vector<2x128xf32>
    %268 = math.exp %267 : vector<2x128xf32>
    %cst_49 = arith.constant 1.000000e+00 : f32
    %269 = vector.broadcast %cst_49 : f32 to vector<2x128xf32>
    %270 = arith.addf %269, %268 : vector<2x128xf32>
    %271 = arith.divf %269, %270 : vector<2x128xf32>
    %272 = math.tanh %266 : vector<2x128xf32>
    %273 = vector.extract_strided_slice %271 {offsets = [0, 0], sizes = [2, 32], strides = [1, 1]} : vector<2x128xf32> to vector<2x32xf32>
    %274 = vector.extract_strided_slice %271 {offsets = [0, 32], sizes = [2, 32], strides = [1, 1]} : vector<2x128xf32> to vector<2x32xf32>
    %275 = vector.extract_strided_slice %272 {offsets = [0, 64], sizes = [2, 32], strides = [1, 1]} : vector<2x128xf32> to vector<2x32xf32>
    %276 = vector.extract_strided_slice %271 {offsets = [0, 96], sizes = [2, 32], strides = [1, 1]} : vector<2x128xf32> to vector<2x32xf32>
    %277 = arith.mulf %274, %258 : vector<2x32xf32>
    %278 = arith.mulf %273, %275 : vector<2x32xf32>
    %279 = arith.addf %277, %278 : vector<2x32xf32>
    %280 = math.tanh %279 : vector<2x32xf32>
    %281 = arith.mulf %276, %280 : vector<2x32xf32>
    %282 = vector.extract_strided_slice %191 {offsets = [0, 4, 0], sizes = [2, 1, 128], strides = [1, 1, 1]} : vector<2x8x128xf32> to vector<2x1x128xf32>
    %283 = vector.shape_cast %282 : vector<2x1x128xf32> to vector<2x128xf32>
    %cst_50 = arith.constant dense<0.000000e+00> : vector<2x128xf32>
    %284 = tpu.matmul %281, %192, %cst_50 {dimension_numbers = #tpu.dot_dimension_numbers<[1], [0], [0], [1], [0, 0, 1, 1], [], []>} : vector<2x32xf32>, vector<32x128xf32>, vector<2x128xf32> -> vector<2x128xf32>
    %285 = arith.addf %283, %284 : vector<2x128xf32>
    %286 = vector.broadcast %193 : vector<1x128xf32> to vector<2x128xf32>
    %287 = arith.addf %285, %286 : vector<2x128xf32>
    %288 = arith.negf %287 : vector<2x128xf32>
    %289 = math.exp %288 : vector<2x128xf32>
    %cst_51 = arith.constant 1.000000e+00 : f32
    %290 = vector.broadcast %cst_51 : f32 to vector<2x128xf32>
    %291 = arith.addf %290, %289 : vector<2x128xf32>
    %292 = arith.divf %290, %291 : vector<2x128xf32>
    %293 = math.tanh %287 : vector<2x128xf32>
    %294 = vector.extract_strided_slice %292 {offsets = [0, 0], sizes = [2, 32], strides = [1, 1]} : vector<2x128xf32> to vector<2x32xf32>
    %295 = vector.extract_strided_slice %292 {offsets = [0, 32], sizes = [2, 32], strides = [1, 1]} : vector<2x128xf32> to vector<2x32xf32>
    %296 = vector.extract_strided_slice %293 {offsets = [0, 64], sizes = [2, 32], strides = [1, 1]} : vector<2x128xf32> to vector<2x32xf32>
    %297 = vector.extract_strided_slice %292 {offsets = [0, 96], sizes = [2, 32], strides = [1, 1]} : vector<2x128xf32> to vector<2x32xf32>
    %298 = arith.mulf %295, %279 : vector<2x32xf32>
    %299 = arith.mulf %294, %296 : vector<2x32xf32>
    %300 = arith.addf %298, %299 : vector<2x32xf32>
    %301 = math.tanh %300 : vector<2x32xf32>
    %302 = arith.mulf %297, %301 : vector<2x32xf32>
    %303 = vector.extract_strided_slice %191 {offsets = [0, 5, 0], sizes = [2, 1, 128], strides = [1, 1, 1]} : vector<2x8x128xf32> to vector<2x1x128xf32>
    %304 = vector.shape_cast %303 : vector<2x1x128xf32> to vector<2x128xf32>
    %cst_52 = arith.constant dense<0.000000e+00> : vector<2x128xf32>
    %305 = tpu.matmul %302, %192, %cst_52 {dimension_numbers = #tpu.dot_dimension_numbers<[1], [0], [0], [1], [0, 0, 1, 1], [], []>} : vector<2x32xf32>, vector<32x128xf32>, vector<2x128xf32> -> vector<2x128xf32>
    %306 = arith.addf %304, %305 : vector<2x128xf32>
    %307 = vector.broadcast %193 : vector<1x128xf32> to vector<2x128xf32>
    %308 = arith.addf %306, %307 : vector<2x128xf32>
    %309 = arith.negf %308 : vector<2x128xf32>
    %310 = math.exp %309 : vector<2x128xf32>
    %cst_53 = arith.constant 1.000000e+00 : f32
    %311 = vector.broadcast %cst_53 : f32 to vector<2x128xf32>
    %312 = arith.addf %311, %310 : vector<2x128xf32>
    %313 = arith.divf %311, %312 : vector<2x128xf32>
    %314 = math.tanh %308 : vector<2x128xf32>
    %315 = vector.extract_strided_slice %313 {offsets = [0, 0], sizes = [2, 32], strides = [1, 1]} : vector<2x128xf32> to vector<2x32xf32>
    %316 = vector.extract_strided_slice %313 {offsets = [0, 32], sizes = [2, 32], strides = [1, 1]} : vector<2x128xf32> to vector<2x32xf32>
    %317 = vector.extract_strided_slice %314 {offsets = [0, 64], sizes = [2, 32], strides = [1, 1]} : vector<2x128xf32> to vector<2x32xf32>
    %318 = vector.extract_strided_slice %313 {offsets = [0, 96], sizes = [2, 32], strides = [1, 1]} : vector<2x128xf32> to vector<2x32xf32>
    %319 = arith.mulf %316, %300 : vector<2x32xf32>
    %320 = arith.mulf %315, %317 : vector<2x32xf32>
    %321 = arith.addf %319, %320 : vector<2x32xf32>
    %322 = math.tanh %321 : vector<2x32xf32>
    %323 = arith.mulf %318, %322 : vector<2x32xf32>
    %324 = vector.extract_strided_slice %191 {offsets = [0, 6, 0], sizes = [2, 1, 128], strides = [1, 1, 1]} : vector<2x8x128xf32> to vector<2x1x128xf32>
    %325 = vector.shape_cast %324 : vector<2x1x128xf32> to vector<2x128xf32>
    %cst_54 = arith.constant dense<0.000000e+00> : vector<2x128xf32>
    %326 = tpu.matmul %323, %192, %cst_54 {dimension_numbers = #tpu.dot_dimension_numbers<[1], [0], [0], [1], [0, 0, 1, 1], [], []>} : vector<2x32xf32>, vector<32x128xf32>, vector<2x128xf32> -> vector<2x128xf32>
    %327 = arith.addf %325, %326 : vector<2x128xf32>
    %328 = vector.broadcast %193 : vector<1x128xf32> to vector<2x128xf32>
    %329 = arith.addf %327, %328 : vector<2x128xf32>
    %330 = arith.negf %329 : vector<2x128xf32>
    %331 = math.exp %330 : vector<2x128xf32>
    %cst_55 = arith.constant 1.000000e+00 : f32
    %332 = vector.broadcast %cst_55 : f32 to vector<2x128xf32>
    %333 = arith.addf %332, %331 : vector<2x128xf32>
    %334 = arith.divf %332, %333 : vector<2x128xf32>
    %335 = math.tanh %329 : vector<2x128xf32>
    %336 = vector.extract_strided_slice %334 {offsets = [0, 0], sizes = [2, 32], strides = [1, 1]} : vector<2x128xf32> to vector<2x32xf32>
    %337 = vector.extract_strided_slice %334 {offsets = [0, 32], sizes = [2, 32], strides = [1, 1]} : vector<2x128xf32> to vector<2x32xf32>
    %338 = vector.extract_strided_slice %335 {offsets = [0, 64], sizes = [2, 32], strides = [1, 1]} : vector<2x128xf32> to vector<2x32xf32>
    %339 = vector.extract_strided_slice %334 {offsets = [0, 96], sizes = [2, 32], strides = [1, 1]} : vector<2x128xf32> to vector<2x32xf32>
    %340 = arith.mulf %337, %321 : vector<2x32xf32>
    %341 = arith.mulf %336, %338 : vector<2x32xf32>
    %342 = arith.addf %340, %341 : vector<2x32xf32>
    %343 = math.tanh %342 : vector<2x32xf32>
    %344 = arith.mulf %339, %343 : vector<2x32xf32>
    %345 = vector.extract_strided_slice %191 {offsets = [0, 7, 0], sizes = [2, 1, 128], strides = [1, 1, 1]} : vector<2x8x128xf32> to vector<2x1x128xf32>
    %346 = vector.shape_cast %345 : vector<2x1x128xf32> to vector<2x128xf32>
    %cst_56 = arith.constant dense<0.000000e+00> : vector<2x128xf32>
    %347 = tpu.matmul %344, %192, %cst_56 {dimension_numbers = #tpu.dot_dimension_numbers<[1], [0], [0], [1], [0, 0, 1, 1], [], []>} : vector<2x32xf32>, vector<32x128xf32>, vector<2x128xf32> -> vector<2x128xf32>
    %348 = arith.addf %346, %347 : vector<2x128xf32>
    %349 = vector.broadcast %193 : vector<1x128xf32> to vector<2x128xf32>
    %350 = arith.addf %348, %349 : vector<2x128xf32>
    %351 = arith.negf %350 : vector<2x128xf32>
    %352 = math.exp %351 : vector<2x128xf32>
    %cst_57 = arith.constant 1.000000e+00 : f32
    %353 = vector.broadcast %cst_57 : f32 to vector<2x128xf32>
    %354 = arith.addf %353, %352 : vector<2x128xf32>
    %355 = arith.divf %353, %354 : vector<2x128xf32>
    %356 = math.tanh %350 : vector<2x128xf32>
    %357 = vector.extract_strided_slice %355 {offsets = [0, 0], sizes = [2, 32], strides = [1, 1]} : vector<2x128xf32> to vector<2x32xf32>
    %358 = vector.extract_strided_slice %355 {offsets = [0, 32], sizes = [2, 32], strides = [1, 1]} : vector<2x128xf32> to vector<2x32xf32>
    %359 = vector.extract_strided_slice %356 {offsets = [0, 64], sizes = [2, 32], strides = [1, 1]} : vector<2x128xf32> to vector<2x32xf32>
    %360 = vector.extract_strided_slice %355 {offsets = [0, 96], sizes = [2, 32], strides = [1, 1]} : vector<2x128xf32> to vector<2x32xf32>
    %361 = arith.mulf %358, %342 : vector<2x32xf32>
    %362 = arith.mulf %357, %359 : vector<2x32xf32>
    %363 = arith.addf %361, %362 : vector<2x32xf32>
    %364 = math.tanh %363 : vector<2x32xf32>
    %365 = arith.mulf %360, %364 : vector<2x32xf32>
    %366 = vector.shape_cast %218 : vector<2x32xf32> to vector<2x1x32xf32>
    %367 = vector.shape_cast %239 : vector<2x32xf32> to vector<2x1x32xf32>
    %368 = vector.shape_cast %260 : vector<2x32xf32> to vector<2x1x32xf32>
    %369 = vector.shape_cast %281 : vector<2x32xf32> to vector<2x1x32xf32>
    %370 = vector.shape_cast %302 : vector<2x32xf32> to vector<2x1x32xf32>
    %371 = vector.shape_cast %323 : vector<2x32xf32> to vector<2x1x32xf32>
    %372 = vector.shape_cast %344 : vector<2x32xf32> to vector<2x1x32xf32>
    %373 = vector.shape_cast %365 : vector<2x32xf32> to vector<2x1x32xf32>
    %374 = tpu.concatenate %366, %367, %368, %369, %370, %371, %372, %373 in 1 : vector<2x1x32xf32>, vector<2x1x32xf32>, vector<2x1x32xf32>, vector<2x1x32xf32>, vector<2x1x32xf32>, vector<2x1x32xf32>, vector<2x1x32xf32>, vector<2x1x32xf32> -> vector<2x8x32xf32>
    %375 = vector.shape_cast %374 : vector<2x8x32xf32> to vector<16x32xf32>
    %c0_58 = arith.constant 0 : index
    %c0_59 = arith.constant 0 : index
    %376 = vector.load %arg8[%c0_58, %c0_59] : memref<32x16xf32, #tpu.memory_space<vmem>>, vector<32x16xf32>
    %cst_60 = arith.constant dense<0.000000e+00> : vector<16x16xf32>
    %377 = tpu.matmul %375, %376, %cst_60 {dimension_numbers = #tpu.dot_dimension_numbers<[1], [0], [0], [1], [0, 0, 1, 1], [], []>} : vector<16x32xf32>, vector<32x16xf32>, vector<16x16xf32> -> vector<16x16xf32>
    %c0_61 = arith.constant 0 : index
    %c0_62 = arith.constant 0 : index
    %378 = vector.load %arg9[%c0_61, %c0_62] : memref<1x16xf32, #tpu.memory_space<vmem>>, vector<1x16xf32>
    %379 = vector.broadcast %378 : vector<1x16xf32> to vector<16x16xf32>
    %380 = arith.addf %377, %379 : vector<16x16xf32>
    %c0_63 = arith.constant 0 : index
    %c0_64 = arith.constant 0 : index
    %381 = vector.load %arg12[%c0_63, %c0_64] : memref<16x16xf32, #tpu.memory_space<vmem>>, vector<16x16xf32>
    tpu.vector_store %arg12[%c0_63, %c0_64], %380 {strides = array<i32>} : memref<16x16xf32, #tpu.memory_space<vmem>>, vector<16x16xf32>,
    %382 = vector.shape_cast %178 : vector<2x32xf32> to vector<1x2x32xf32>
    %383 = vector.shape_cast %365 : vector<2x32xf32> to vector<1x2x32xf32>
    %384 = tpu.concatenate %382, %383 in 0 : vector<1x2x32xf32>, vector<1x2x32xf32> -> vector<2x2x32xf32>
    %c0_65 = arith.constant 0 : index
    %c0_66 = arith.constant 0 : index
    %c0_67 = arith.constant 0 : index
    %385 = vector.load %arg13[%c0_65, %c0_66, %c0_67] : memref<2x2x32xf32, #tpu.memory_space<vmem>>, vector<2x2x32xf32>
    tpu.vector_store %arg13[%c0_65, %c0_66, %c0_67], %384 {strides = array<i32>} : memref<2x2x32xf32, #tpu.memory_space<vmem>>, vector<2x2x32xf32>,
    %386 = vector.shape_cast %176 : vector<2x32xf32> to vector<1x2x32xf32>
    %387 = vector.shape_cast %363 : vector<2x32xf32> to vector<1x2x32xf32>
    %388 = tpu.concatenate %386, %387 in 0 : vector<1x2x32xf32>, vector<1x2x32xf32> -> vector<2x2x32xf32>
    %c0_68 = arith.constant 0 : index
    %c0_69 = arith.constant 0 : index
    %c0_70 = arith.constant 0 : index
    %389 = vector.load %arg14[%c0_68, %c0_69, %c0_70] : memref<2x2x32xf32, #tpu.memory_space<vmem>>, vector<2x2x32xf32>
    tpu.vector_store %arg14[%c0_68, %c0_69, %c0_70], %388 {strides = array<i32>} : memref<2x2x32xf32, #tpu.memory_space<vmem>>, vector<2x2x32xf32>,
    return
  }
  func.func @transform_0(%arg0: i32) -> (i32, i32, i32) {
    %c0_i32 = arith.constant 0 : i32
    %c0_i32_0 = arith.constant 0 : i32
    %c0_i32_1 = arith.constant 0 : i32
    %c0_i32_2 = arith.constant 0 : i32
    return %c0_i32, %c0_i32_0, %c0_i32_1 : i32, i32, i32
  }
  func.func @transform_1(%arg0: i32) -> (i32, i32) {
    %c0_i32 = arith.constant 0 : i32
    %c0_i32_0 = arith.constant 0 : i32
    %c0_i32_1 = arith.constant 0 : i32
    return %c0_i32, %c0_i32_0 : i32, i32
  }
  func.func @transform_2(%arg0: i32) -> (i32, i32) {
    %c0_i32 = arith.constant 0 : i32
    %c0_i32_0 = arith.constant 0 : i32
    %c0_i32_1 = arith.constant 0 : i32
    return %c0_i32, %c0_i32_0 : i32, i32
  }
  func.func @transform_3(%arg0: i32) -> (i32, i32) {
    %c0_i32 = arith.constant 0 : i32
    %c0_i32_0 = arith.constant 0 : i32
    %c0_i32_1 = arith.constant 0 : i32
    return %c0_i32, %c0_i32_0 : i32, i32
  }
  func.func @transform_4(%arg0: i32) -> (i32, i32) {
    %c0_i32 = arith.constant 0 : i32
    %c0_i32_0 = arith.constant 0 : i32
    %c0_i32_1 = arith.constant 0 : i32
    return %c0_i32, %c0_i32_0 : i32, i32
  }
  func.func @transform_5(%arg0: i32) -> (i32, i32) {
    %c0_i32 = arith.constant 0 : i32
    %c0_i32_0 = arith.constant 0 : i32
    %c0_i32_1 = arith.constant 0 : i32
    return %c0_i32, %c0_i32_0 : i32, i32
  }
  func.func @transform_6(%arg0: i32) -> (i32, i32) {
    %c0_i32 = arith.constant 0 : i32
    %c0_i32_0 = arith.constant 0 : i32
    %c0_i32_1 = arith.constant 0 : i32
    return %c0_i32, %c0_i32_0 : i32, i32
  }
  func.func @transform_7(%arg0: i32) -> (i32, i32) {
    %c0_i32 = arith.constant 0 : i32
    %c0_i32_0 = arith.constant 0 : i32
    %c0_i32_1 = arith.constant 0 : i32
    return %c0_i32, %c0_i32_0 : i32, i32
  }
  func.func @transform_8(%arg0: i32) -> (i32, i32) {
    %c0_i32 = arith.constant 0 : i32
    %c0_i32_0 = arith.constant 0 : i32
    %c0_i32_1 = arith.constant 0 : i32
    return %c0_i32, %c0_i32_0 : i32, i32
  }
  func.func @transform_9(%arg0: i32) -> (i32, i32, i32) {
    %c0_i32 = arith.constant 0 : i32
    %c0_i32_0 = arith.constant 0 : i32
    %c0_i32_1 = arith.constant 0 : i32
    %c0_i32_2 = arith.constant 0 : i32
    return %c0_i32, %c0_i32_0, %c0_i32_1 : i32, i32, i32
  }
  func.func @transform_10(%arg0: i32) -> (i32, i32, i32) {
    %c0_i32 = arith.constant 0 : i32
    %c0_i32_0 = arith.constant 0 : i32
    %c0_i32_1 = arith.constant 0 : i32
    %c0_i32_2 = arith.constant 0 : i32
    return %c0_i32, %c0_i32_0, %c0_i32_1 : i32, i32, i32
  }
  func.func @transform_11(%arg0: i32) -> (i32, i32) {
    %c0_i32 = arith.constant 0 : i32
    %c0_i32_0 = arith.constant 0 : i32
    %c0_i32_1 = arith.constant 0 : i32
    return %c0_i32, %c0_i32_0 : i32, i32
  }
  func.func @transform_12(%arg0: i32) -> (i32, i32, i32) {
    %c0_i32 = arith.constant 0 : i32
    %c0_i32_0 = arith.constant 0 : i32
    %c0_i32_1 = arith.constant 0 : i32
    %c0_i32_2 = arith.constant 0 : i32
    return %c0_i32, %c0_i32_0, %c0_i32_1 : i32, i32, i32
  }
  func.func @transform_13(%arg0: i32) -> (i32, i32, i32) {
    %c0_i32 = arith.constant 0 : i32
    %c0_i32_0 = arith.constant 0 : i32
    %c0_i32_1 = arith.constant 0 : i32
    %c0_i32_2 = arith.constant 0 : i32
    return %c0_i32, %c0_i32_0, %c0_i32_1 : i32, i32, i32
  }
}

</mosaic_0001>

<bundles_post_ra>
// kernel: character_level_lstm_forward.1
= control target key start
LH: loop header
LB: loop body
LE: loop exit
PB: predicated region body
PF: predicated region fallthrough
CT: control target
= control target key end

     0   :  { %19 = vsyncpa [#allocation3], 0  ;;  %s4444_s0 = inlined_call_operand.vmem [shape: f32[2,8,16], index: 0, kind: input, shape index: {}]   ;;  %s4445_s1 = inlined_call_operand.hbm [shape: f32[16,128], index: 1, kind: input, shape index: {}]   ;;  %s4446_s2 = inlined_call_operand.vmem [shape: f32[32,128], index: 2, kind: input, shape index: {}]   ;;  %s4447_s3 = inlined_call_operand.hbm [shape: f32[1,128], index: 3, kind: input, shape index: {}]   ;;  %s4448_s4 = inlined_call_operand.hbm [shape: f32[32,128], index: 4, kind: input, shape index: {}]   ;;  %s4449_s5 = inlined_call_operand.hbm [shape: f32[32,128], index: 5, kind: input, shape index: {}]   ;;  %s4450_s6 = inlined_call_operand.hbm [shape: f32[1,128], index: 6, kind: input, shape index: {}]   ;;  %s4451_s7 = inlined_call_operand.vmem [shape: f32[32,16], index: 7, kind: input, shape index: {}]   ;;  %s4452_s8 = inlined_call_operand.vmem [shape: f32[1,16], index: 8, kind: input, shape index: {}]   ;;  %s4453_s9 = inlined_call_operand.hbm [shape: f32[2,2,32], index: 9, kind: input, shape index: {}]   ;;  %s4454_s10 = inlined_call_operand.hbm [shape: f32[2,2,32], index: 10, kind: input, shape index: {}]   ;;  %s4455_s11 = inlined_call_operand.hbm [shape: f32[16,16], index: 11, kind: output, shape index: {0}]   ;;  %s4456_s12 = inlined_call_operand.hbm [shape: f32[2,2,32], index: 12, kind: output, shape index: {1}]   ;;  %s4457_s13 = inlined_call_operand.hbm [shape: f32[2,2,32], index: 13, kind: output, shape index: {2}]  }
   0x1   :  { %20 = vsyncpa [#allocation6], 0 }
   0x2   :  { %21 = vsyncpa [#allocation9], 0 }
   0x3   :  { %22 = vsyncpa [#allocation12], 0 }
   0x4   :  { %23 = vsyncpa [#allocation4], 0 }
   0x5   :  { %24 = vsyncpa [#allocation16], 0  ;;  %s3669_s25 = smov [#allocation5]  }
   0x6   :  { %s47_s26 = sshll.u32 %s3669_s25, 4  ;;  %s48_s26 = int_to_ptr.vmem [resolvable:$true] %s47_s26 }
   0x7   :  { %s3465_s27 = scalar_lea.vmem %s48_s26, 16  ;;  %s3469_s28 = scalar_lea.vmem %s48_s26, 32 }
   0x8   :  { %p3466_p0 = scmp.ne.s32.totalorder %s48_s26, %s3465_s27  ;;  %p3470_p1 = scmp.lt.s32.totalorder %s48_s26, %s48_s26 }
   0x9   :  { %p3471_p2 = scmp.lt.s32.totalorder %s3469_s28, %s3465_s27 }
   0xb   :  { %p3472_p3 = por %p3471_p2, %p3470_p1 }
   0xd   :  { %p3473_p4 = pnand %p3472_p3, %p3466_p0 }
   0xf   :  { %3476 = shalt.err (!%p3473_p4)
}
  0x10   :  { %50 = dma.hbm_to_vmem [thread:$0]  %s4447_s3, 16, %s48_s26, [#allocation6]  }
  0x11   :  { %s3670_s14 = smov [#allocation8]   ;;  %s3671_s16 = smov [#allocation11]  }
  0x12   :  { %s68_s15 = sshll.u32 %s3670_s14, 4  ;;  %s94_s17 = sshll.u32 %s3671_s16, 4  ;;  %s69_s15 = int_to_ptr.vmem [resolvable:$true] %s68_s15  ;;  %s95_s17 = int_to_ptr.vmem [resolvable:$true] %s94_s17 }
  0x13   :  { %s3485_s18 = scalar_lea.vmem %s69_s15, 512  ;;  %p3490_p6 = scmp.lt.s32.totalorder %s69_s15, %s69_s15 }
  0x14   :  { %p3486_p5 = scmp.ne.s32.totalorder %s69_s15, %s3485_s18  ;;  %p3491_p7 = scmp.lt.s32.totalorder %s3485_s18, %s3485_s18 }
  0x16   :  { %p3492_p8 = por %p3491_p7, %p3490_p6 }
  0x18   :  { %p3493_p9 = pnand %p3492_p8, %p3486_p5 }
  0x1a   :  { %3496 = shalt.err (!%p3493_p9)
}
  0x1b   :  { %s3672_s19 = smov 128   ;;  %s3673_s20 = smov 8  }
  0x1c   :  { %74 = dma.hbm_to_vmem [thread:$0]  %s4449_s5, 512, %s69_s15, [#allocation9], %s3672_s19, %s3672_s19, %s3673_s20  }
  0x1d   :  { %s3505_s3 = scalar_lea.vmem %s95_s17, 64  ;;  %p3510_p11 = scmp.lt.s32.totalorder %s95_s17, %s95_s17 }
  0x1e   :  { %p3506_p10 = scmp.ne.s32.totalorder %s95_s17, %s3505_s3  ;;  %p3511_p12 = scmp.lt.s32.totalorder %s3505_s3, %s3505_s3 }
  0x20   :  { %p3512_p13 = por %p3511_p12, %p3510_p11 }
  0x22   :  { %p3513_p0 = pnand %p3512_p13, %p3506_p10 }
  0x24   :  { %3516 = shalt.err (!%p3513_p0)
}
  0x25   :  { %s3674_s23 = smov 32   ;;  %s3675_s24 = smov 2  }
  0x26   :  { %100 = dma.hbm_to_vmem [thread:$0]  %s4453_s9, 64, %s95_s17, [#allocation12], %s3674_s23, %s3674_s23, %s3675_s24  }
  0x27   :  { %s3676_s27 = smov [#allocation2]   ;;  %s3677_s5 = smov [#allocation7]  }
  0x28   :  { %s32_s28 = sshll.u32 %s3676_s27, 4  ;;  %s56_s29 = sshll.u32 %s3677_s5, 4  ;;  %s33_s28 = int_to_ptr.vmem [resolvable:$true] %s32_s28  ;;  %s57_s29 = int_to_ptr.vmem [resolvable:$true] %s56_s29 }
  0x29   :  { %s3525_s30 = scalar_lea.vmem %s33_s28, 256  ;;  %p3530_p2 = scmp.lt.s32.totalorder %s33_s28, %s33_s28 }
  0x2a   :  { %p3526_p1 = scmp.ne.s32.totalorder %s33_s28, %s3525_s30  ;;  %p3531_p3 = scmp.lt.s32.totalorder %s3525_s30, %s3525_s30 }
  0x2c   :  { %p3532_p4 = por %p3531_p3, %p3530_p2 }
  0x2e   :  { %p3533_p5 = pnand %p3532_p4, %p3526_p1 }
  0x30   :  { %3536 = shalt.err (!%p3533_p5)
}
  0x31   :  { %38 = dma.hbm_to_vmem [thread:$0]  %s4445_s1, 256, %s33_s28, [#allocation3], %s3672_s19, %s3672_s19, %s3673_s20  }
  0x32   :  { %s3545_s9 = scalar_lea.vmem %s57_s29, 512  ;;  %p3550_p7 = scmp.lt.s32.totalorder %s57_s29, %s57_s29 }
  0x33   :  { %p3546_p6 = scmp.ne.s32.totalorder %s57_s29, %s3545_s9  ;;  %p3551_p8 = scmp.lt.s32.totalorder %s3545_s9, %s3545_s9 }
  0x35   :  { %p3552_p9 = por %p3551_p8, %p3550_p7 }
  0x37   :  { %p3553_p10 = pnand %p3552_p9, %p3546_p6 }
  0x39   :  { %3556 = shalt.err (!%p3553_p10)
}
  0x3a   :  { %62 = dma.hbm_to_vmem [thread:$0]  %s4448_s4, 512, %s57_s29, [#allocation6], %s3672_s19, %s3672_s19, %s3673_s20  }
  0x3b   :  { %s3678_s18 = smov [#allocation10]   ;;  %s3679_s22 = smov [#allocation13]  }
  0x3c   :  { %s81_s21 = sshll.u32 %s3678_s18, 4  ;;  %s106_s1 = sshll.u32 %s3679_s22, 4  ;;  %s82_s21 = int_to_ptr.vmem [resolvable:$true] %s81_s21  ;;  %s107_s1 = int_to_ptr.vmem [resolvable:$true] %s106_s1 }
  0x3d   :  { %s3565_s3 = scalar_lea.vmem %s82_s21, 16  ;;  %s3569_s25 = scalar_lea.vmem %s82_s21, 32 }
  0x3e   :  { %p3566_p11 = scmp.ne.s32.totalorder %s82_s21, %s3565_s3  ;;  %p3570_p12 = scmp.lt.s32.totalorder %s82_s21, %s82_s21 }
  0x3f   :  { %p3571_p13 = scmp.lt.s32.totalorder %s3569_s25, %s3565_s3 }
  0x41   :  { %p3572_p0 = por %p3571_p13, %p3570_p12 }
  0x43   :  { %p3573_p1 = pnand %p3572_p0, %p3566_p11 }
  0x45   :  { %3576 = shalt.err (!%p3573_p1)
}
  0x46   :  { %84 = dma.hbm_to_vmem [thread:$0]  %s4450_s6, 16, %s82_s21, [#allocation9]  }
  0x47   :  { %s3585_s28 = scalar_lea.vmem %s107_s1, 64  ;;  %p3590_p3 = scmp.lt.s32.totalorder %s107_s1, %s107_s1 }
  0x48   :  { %p3586_p2 = scmp.ne.s32.totalorder %s107_s1, %s3585_s28  ;;  %p3591_p4 = scmp.lt.s32.totalorder %s3585_s28, %s3585_s28 }
  0x4a   :  { %p3592_p5 = por %p3591_p4, %p3590_p3 }
  0x4c   :  { %p3593_p6 = pnand %p3592_p5, %p3586_p2 }
  0x4e   :  { %3596 = shalt.err (!%p3593_p6)
}
  0x4f   :  { %112 = dma.hbm_to_vmem [thread:$0]  %s4454_s10, 64, %s107_s1, [#allocation12], %s3674_s23, %s3674_s23, %s3675_s24  }
  0x50   :  { %3657 = dma.done.wait [#allocation3], 256  }
  0x51   :  { %3658 = vsyncadd [#allocation3], 4294967040 }
  0x52   :  { %3659 = dma.done.wait [#allocation6], 528  }
  0x53   :  { %3660 = vsyncadd [#allocation6], 4294966768 }
  0x54   :  { %3661 = dma.done.wait [#allocation9], 528  }
  0x55   :  { %3662 = vsyncadd [#allocation9], 4294966768 }
  0x56   :  { %3663 = dma.done.wait [#allocation12], 128  }
  0x57   :  { %3664 = vsyncadd [#allocation12], 4294967168  ;;  %v3680_v0 = vmov 0.0   ;;  %vm3681_vm0 = vmmov 0   ;;  %v3799_v1 = vld [vmem:[%s4446_s2 + $0x18] sm:$0xff]  ;;  %v137_v2 = vld [vmem:[#allocation2 + $0x8] sm:$0xff] }
  0x58   :  { %2985 = vmatprep.subr.mxu1 %v3680_v0  ;;  %2993 = vmatprep.mubr.msk.f32.mxu1 %vm3681_vm0, %v3680_v0  ;;  %v3804_v3 = vld [vmem:[%s4446_s2 + $0x10] sm:$0xff]  ;;  %v136_v4 = vld [vmem:[#allocation2] sm:$0xff]  ;;  %vm138_vm1 = vcmask 130048   ;;  %v3814_v6 = vld [vmem:[%s4446_s2 + $0x8] sm:$0xff]  ;;  %vm227_vm2 = vcmask 261120   ;;  %vm374_vm3 = vcmask 1041409  }
  0x59   :  { %2986 = vmatpush3.msra.mxu1 %v3799_v1  ;;  %2978 = vmatprep.subr.mxu0 %v137_v2  ;;  %v134_v5 = vld [vmem:[%s4444_s0] sm:$0xff]  ;;  %v135_v7 = vld [vmem:[%s4444_s0 + $0x8] sm:$0xff]  ;;  %v226_v8 = vld [vmem:[#allocation13] sm:$0x3]  ;;  %s3682_s0 = smov 64   ;;  %vm1363_vm4 = vcmask 1040384  }
  0x5a   :  { %2987 = vmatprep.subr.mxu1 %v3680_v0  ;;  %2979 = vmatpush3.msra.mxu0 %v137_v2  ;;  %v3824_v9 = vld [vmem:[%s4446_s2] sm:$0xff]  ;;  %v330_v10 = vrot.slane %v226_v8, 1  ;;  %v225_v11 = vld [vmem:[#allocation11] sm:$0x3]  ;;  %v3861_v18 = vld [vmem:[#allocation5] ss:$0 sm:$0xff] }
  0x5b   :  { %2988 = vmatpush3.msra.mxu1 %v3804_v3  ;;  %2980 = vmatprep.subr.mxu0 %v136_v4  ;;  %vm1366_vm5 = vcmask 1041408   ;;  %vm1369_vm6 = vcmask 1042432   ;;  %vm1372_vm7 = vcmask 1043456   ;;  %vm1375_vm8 = vcmask 1044480   ;;  %s3684_s5 = smov [#allocation15]  }
  0x5c   :  { %2989 = vmatprep.subr.mxu1 %v3680_v0  ;;  %2981 = vmatpush3.msra.mxu0 %v136_v4  ;;  %vm1378_vm9 = vcmask 1045504   ;;  %vm1381_vm10 = vcmask 1046528   ;;  %vm2746_vm11 = vcmask 261127   ;;  %vm2748_vm12 = vcmask 253952   ;;  %s2791_s6 = sshll.u32 %s3684_s5, 4  ;;  %s2792_s6 = int_to_ptr.vmem [resolvable:$true] %s2791_s6 }
  0x5d   :  { %2982 = vmatprep.mubr.msk.f32.mxu0 %vm138_vm1, %v134_v5  ;;  %2990 = vmatpush3.msra.mxu1 %v3814_v6  ;;  %s3597_s29 = scalar_lea.vmem %s2792_s6, 64  ;;  %p3602_p8 = scmp.lt.s32.totalorder %s2792_s6, %s2792_s6 }
  0x5e   :  { %2983 = vmatmul.mubr.msk.f32.vlgmr.msra.gmra.mxu0 %vm138_vm1, %v135_v7  ;;  %2991 = vmatprep.subr.mxu1 %v3680_v0  ;;  %p3598_p7 = scmp.ne.s32.totalorder %s2792_s6, %s3597_s29  ;;  %p3603_p9 = scmp.lt.s32.totalorder %s3597_s29, %s3597_s29 }
  0x5f   :  { %2992 = vmatpush3.msra.mxu1 %v3824_v9  ;;  %333 = vrot.lane.b32.xlu1 %v330_v10, %s3674_s23 }
  0x60   :  { %2994 = vmatmul.mubr.msk.f32.vlgmr.msra.gmra.mxu1 %vm227_vm2, %v225_v11  ;;  %2996 = vmatprep.subr.mxu0 %v3680_v0  ;;  %p3604_p10 = por %p3603_p9, %p3602_p8 }
  0x61   :  { %2997 = vmatpush3.msra.mxu0 %v3799_v1  ;;  %3004 = vmatprep.mubr.msk.f32.mxu0 %vm3681_vm0, %v3680_v0 }
  0x62   :  { %2998 = vmatprep.subr.mxu0 %v3680_v0  ;;  %3007 = vmatprep.subr.mxu1 %v3680_v0  ;;  %p3605_p11 = pnand %p3604_p10, %p3598_p7 }
  0x63   :  { %331 = vrot.lane.b32.xlu1 %v226_v8, %s3674_s23  ;;  %2999 = vmatpush3.msra.mxu0 %v3804_v3 }
  0x64   :  { %3000 = vmatprep.subr.mxu0 %v3680_v0  ;;  %3008 = vmatpush3.msra.mxu1 %v3799_v1 }
  0x65   :  { %3001 = vmatpush3.msra.mxu0 %v3814_v6  ;;  %3009 = vmatprep.subr.mxu1 %v3680_v0 }
  0x66   :  { %3002 = vmatprep.subr.mxu0 %v3680_v0  ;;  %3010 = vmatpush3.msra.mxu1 %v3804_v3 }
  0x67   :  { %3003 = vmatpush3.msra.mxu0 %v3824_v9  ;;  %3011 = vmatprep.subr.mxu1 %v3680_v0 }
  0x68   :  { %3012 = vmatpush3.msra.mxu1 %v3814_v6  ;;  %3015 = vmatprep.mubr.msk.f32.mxu1 %vm3681_vm0, %v3680_v0 }
  0x69   :  { %3013 = vmatprep.subr.mxu1 %v3680_v0  ;;  %3018 = vmatprep.subr.mxu0 %v3680_v0 }
  0x6a   :  { %3014 = vmatpush3.msra.mxu1 %v3824_v9 }
  0x6b   :  { %3029 = vmatprep.subr.mxu1 %v3680_v0 }
  0xd1   :  { %v334_v36 = vpop.permute.xlu1 %333 }
  0xd5   :  { %v332_v38 = vpop.permute.xlu1 %331 }
 0x11e   :  { %v3856_v12 = vpop.f32.mrf.mxu0 }
 0x120   :  { %v297_v13 = vpop.f32.mrf.mxu1  ;;  %v3858_v14 = vpop.f32.mrf.mxu0 }
 0x121   :  { %v302_v15 = vrot.slane %v297_v13, 1  ;;  %v305_v19 = vadd.f32 %v297_v13, %v3858_v14 }
 0x122   :  { %v2995_v16 = vpop.f32.mrf.mxu1 }
 0x123   :  { %v306_v17 = vadd.f32 %v3856_v12, %v302_v15  ;;  %v313_v21 = vadd.f32 %v3861_v18, %v305_v19 }
 0x125   :  { %v314_v20 = vadd.f32 %v3861_v18, %v306_v17  ;;  %v2829_v25 = vmul.f32 -1.442695, %v313_v21 }
 0x127   :  { %3201 = vtanh.f32 %v314_v20  ;;  %v2830_v24 = vmul.f32 -1.442695, %v314_v20 }
 0x128   :  { %3203 = vtanh.f32 %v313_v21 }
 0x129   :  { %3205 = vpow2.f32 %v2830_v24 }
 0x12a   :  { %3207 = vpow2.f32 %v2829_v25 }
 0x134   :  { %v3202_v22 = vpop.eup %3201 }
 0x135   :  { %343 = vrot.lane.b32.xlu0 %v3202_v22, %s3682_s0  ;;  %v3204_v23 = vpop.eup %3203 }
 0x136   :  { %v3206_v26 = vpop.eup %3205 }
 0x137   :  { %v322_v27 = vadd.f32 1.0, %v3206_v26  ;;  %v3208_v28 = vpop.eup %3207 }
 0x138   :  { %v321_v29 = vadd.f32 1.0, %v3208_v28 }
 0x139   :  { %341 = vrot.lane.b32.xlu0 %v3204_v23, %s3682_s0  ;;  %3209 = vrcp.f32 %v322_v27 }
 0x13a   :  { %3211 = vrcp.f32 %v321_v29 }
 0x146   :  { %v3210_v30 = vpop.eup %3209 }
 0x147   :  { %v3212_v33 = vpop.eup %3211  ;;  %v338_v37 = vmul.f32 %v3210_v30, %v334_v36 }
 0x148   :  { %v337_v41 = vmul.f32 %v3212_v33, %v332_v38 }
 0x1a7   :  { %v344_v31 = vpop.permute.xlu0 %343 }
 0x1a8   :  { %v348_v32 = vmul.f32 %v3210_v30, %v344_v31 }
 0x1aa   :  { %353 = vrot.lane.b32.xlu0 %v348_v32, %s3674_s23 }
 0x1ab   :  { %v342_v34 = vpop.permute.xlu0 %341 }
 0x1ac   :  { %v347_v35 = vmul.f32 %v3212_v33, %v342_v34 }
 0x1ae   :  { %351 = vrot.lane.b32.xlu1 %v347_v35, %s3674_s23 }
 0x21c   :  { %v354_v39 = vpop.permute.xlu0 %353 }
 0x21d   :  { %v358_v40 = vadd.f32 %v354_v39, %v338_v37 }
 0x21f   :  { %3213 = vtanh.f32 %v358_v40  ;;  %v475_v17 = vrot.slane %v358_v40, 7 }
 0x220   :  { %v352_v42 = vpop.permute.xlu1 %351 }
 0x221   :  { %v357_v43 = vadd.f32 %v352_v42, %v337_v41 }
 0x223   :  { %3215 = vtanh.f32 %v357_v43  ;;  %v474_v20 = vrot.slane %v357_v43, 7 }
 0x22c   :  { %v3214_v44 = vpop.eup %3213 }
 0x22d   :  { %365 = vrot.lane.b32.xlu0 %v3214_v44, %s3682_s0 }
 0x230   :  { %v3216_v45 = vpop.eup %3215 }
 0x231   :  { %363 = vrot.lane.b32.xlu1 %v3216_v45, %s3682_s0 }
 0x29f   :  { %v366_v46 = vpop.permute.xlu0 %365 }
 0x2a0   :  { %v3872_v47 = vmul.f32 %v3210_v30, %v366_v46 }
 0x2a2   :  { %v373_v49 = vrot.slane %v3872_v47, 7 }
 0x2a3   :  { %v364_v48 = vpop.permute.xlu1 %363 }
 0x2a4   :  { %v3875_v50 = vmul.f32 %v3212_v33, %v364_v48 }
 0x2a6   :  { %v375_v51 = vsel %vm374_vm3, %v373_v49, %v3875_v50 }
 0x2a7   :  { %376 = vrot.lane.b32.xlu0 %v375_v51, %s3674_s23 }
 0x319   :  { %v377_v52 = vpop.permute.xlu0 %376 }
 0x31a   :  { %3005 = vmatmul.mubr.msk.f32.vlgmr.msra.gmra.mxu0 %vm227_vm2, %v377_v52 }
 0x31b   :  { %3019 = vmatpush3.msra.mxu0 %v3799_v1  ;;  %3026 = vmatprep.mubr.msk.f32.mxu0 %vm3681_vm0, %v3680_v0 }
 0x31c   :  { %3020 = vmatprep.subr.mxu0 %v3680_v0 }
 0x31d   :  { %3021 = vmatpush3.msra.mxu0 %v3804_v3 }
 0x31e   :  { %3022 = vmatprep.subr.mxu0 %v3680_v0 }
 0x31f   :  { %3023 = vmatpush3.msra.mxu0 %v3814_v6 }
 0x320   :  { %3024 = vmatprep.subr.mxu0 %v3680_v0 }
 0x321   :  { %3025 = vmatpush3.msra.mxu0 %v3824_v9 }
 0x322   :  { %3040 = vmatprep.subr.mxu0 %v3680_v0 }
 0x3da   :  { %v446_v53 = vpop.f32.mrf.mxu0 }
 0x3db   :  { %v451_v54 = vrot.slane %v446_v53, 7  ;;  %v455_v55 = vadd.f32 %v3856_v12, %v446_v53 }
 0x3dc   :  { %v3006_v56 = vpop.f32.mrf.mxu0 }
 0x3dd   :  { %v454_v57 = vadd.f32 %v451_v54, %v3858_v14  ;;  %v457_v58 = vadd.f32 %v3861_v18, %v455_v55 }
 0x3df   :  { %v456_v59 = vadd.f32 %v3861_v18, %v454_v57  ;;  %3217 = vtanh.f32 %v457_v58  ;;  %v2833_v62 = vmul.f32 -1.442695, %v457_v58 }
 0x3e1   :  { %3219 = vtanh.f32 %v456_v59  ;;  %v2832_v63 = vmul.f32 -1.442695, %v456_v59 }
 0x3e2   :  { %3221 = vpow2.f32 %v2833_v62 }
 0x3e3   :  { %3223 = vpow2.f32 %v2832_v63 }
 0x3ec   :  { %v3218_v60 = vpop.eup %3217 }
 0x3ed   :  { %484 = vrot.lane.b32.xlu0 %v3218_v60, %s3682_s0 }
 0x3ee   :  { %v3220_v61 = vpop.eup %3219 }
 0x3ef   :  { %482 = vrot.lane.b32.xlu1 %v3220_v61, %s3682_s0  ;;  %v3222_v2 = vpop.eup %3221 }
 0x3f0   :  { %v3224_v4 = vpop.eup %3223  ;;  %v465_v5 = vadd.f32 1.0, %v3222_v2 }
 0x3f1   :  { %v464_v7 = vadd.f32 1.0, %v3224_v4 }
 0x3f2   :  { %3225 = vrcp.f32 %v465_v5 }
 0x3f3   :  { %3227 = vrcp.f32 %v464_v7 }
 0x3ff   :  { %v3226_v8 = vpop.eup %3225 }
 0x400   :  { %v3228_v13 = vpop.eup %3227  ;;  %v479_v19 = vmul.f32 %v3226_v8, %v475_v17 }
 0x401   :  { %v478_v23 = vmul.f32 %v3228_v13, %v474_v20 }
 0x45f   :  { %v485_v10 = vpop.permute.xlu0 %484 }
 0x460   :  { %v489_v11 = vmul.f32 %v3226_v8, %v485_v10 }
 0x461   :  { %v483_v15 = vpop.permute.xlu1 %482 }
 0x462   :  { %494 = vrot.lane.b32.xlu0 %v489_v11, %s3674_s23  ;;  %v488_v16 = vmul.f32 %v3228_v13, %v483_v15 }
 0x464   :  { %492 = vrot.lane.b32.xlu1 %v488_v16, %s3674_s23 }
 0x4d4   :  { %v495_v21 = vpop.permute.xlu0 %494 }
 0x4d5   :  { %v3899_v22 = vadd.f32 %v495_v21, %v479_v19 }
 0x4d6   :  { %v493_v24 = vpop.permute.xlu1 %492 }
 0x4d7   :  { %3229 = vtanh.f32 %v3899_v22  ;;  %v498_v25 = vadd.f32 %v493_v24, %v478_v23  ;;  %v616_v60 = vrot.slane %v3899_v22, 7 }
 0x4d9   :  { %3231 = vtanh.f32 %v498_v25  ;;  %v615_v59 = vrot.slane %v498_v25, 7 }
 0x4e4   :  { %v3230_v26 = vpop.eup %3229 }
 0x4e5   :  { %506 = vrot.lane.b32.xlu0 %v3230_v26, %s3682_s0 }
 0x4e6   :  { %v3232_v27 = vpop.eup %3231 }
 0x4e7   :  { %504 = vrot.lane.b32.xlu1 %v3232_v27, %s3682_s0 }
 0x557   :  { %v507_v28 = vpop.permute.xlu0 %506 }
 0x558   :  { %v3906_v31 = vmul.f32 %v3226_v8, %v507_v28 }
 0x559   :  { %v505_v29 = vpop.permute.xlu1 %504 }
 0x55a   :  { %v3904_v30 = vmul.f32 %v3228_v13, %v505_v29  ;;  %v1365_v17 = vsel %vm1363_vm4, %v3872_v47, %v3906_v31 }
 0x55c   :  { %v514_v32 = vrot.slane %v3904_v30, 1  ;;  %v1364_v15 = vsel %vm1363_vm4, %v3875_v50, %v3904_v30 }
 0x55e   :  { %v515_v33 = vsel %vm374_vm3, %v3906_v31, %v514_v32 }
 0x55f   :  { %516 = vrot.lane.b32.xlu1 %v515_v33, %s3674_s23 }
 0x5d1   :  { %v517_v34 = vpop.permute.xlu1 %516 }
 0x5d2   :  { %3016 = vmatmul.mubr.msk.f32.vlgmr.msra.gmra.mxu1 %vm227_vm2, %v517_v34 }
 0x5d3   :  { %3030 = vmatpush3.msra.mxu1 %v3799_v1  ;;  %3037 = vmatprep.mubr.msk.f32.mxu1 %vm3681_vm0, %v3680_v0 }
 0x5d4   :  { %3031 = vmatprep.subr.mxu1 %v3680_v0 }
 0x5d5   :  { %3032 = vmatpush3.msra.mxu1 %v3804_v3 }
 0x5d6   :  { %3033 = vmatprep.subr.mxu1 %v3680_v0 }
 0x5d7   :  { %3034 = vmatpush3.msra.mxu1 %v3814_v6 }
 0x5d8   :  { %3035 = vmatprep.subr.mxu1 %v3680_v0 }
 0x5d9   :  { %3036 = vmatpush3.msra.mxu1 %v3824_v9 }
 0x5da   :  { %3051 = vmatprep.subr.mxu1 %v3680_v0 }
 0x692   :  { %v586_v35 = vpop.f32.mrf.mxu1 }
 0x693   :  { %v591_v36 = vrot.slane %v586_v35, 6  ;;  %v592_v37 = vrot.slane %v586_v35, 7 }
 0x694   :  { %v3017_v38 = vpop.f32.mrf.mxu1 }
 0x695   :  { %v595_v39 = vadd.f32 %v591_v36, %v3858_v14  ;;  %v596_v40 = vadd.f32 %v3856_v12, %v592_v37 }
 0x697   :  { %v597_v41 = vadd.f32 %v3861_v18, %v595_v39  ;;  %v598_v42 = vadd.f32 %v3861_v18, %v596_v40 }
 0x699   :  { %3233 = vtanh.f32 %v597_v41  ;;  %v2835_v45 = vmul.f32 -1.442695, %v597_v41  ;;  %v2836_v46 = vmul.f32 -1.442695, %v598_v42 }
 0x69a   :  { %3235 = vtanh.f32 %v598_v42 }
 0x69b   :  { %3237 = vpow2.f32 %v2835_v45 }
 0x69c   :  { %3239 = vpow2.f32 %v2836_v46 }
 0x6a6   :  { %v3234_v43 = vpop.eup %3233 }
 0x6a7   :  { %v3236_v44 = vpop.eup %3235  ;;  %623 = vrot.lane.b32.xlu0 %v3234_v43, %s3682_s0 }
 0x6a8   :  { %625 = vrot.lane.b32.xlu1 %v3236_v44, %s3682_s0  ;;  %v3238_v48 = vpop.eup %3237 }
 0x6a9   :  { %v3240_v49 = vpop.eup %3239  ;;  %v605_v51 = vadd.f32 1.0, %v3238_v48 }
 0x6aa   :  { %v606_v52 = vadd.f32 1.0, %v3240_v49 }
 0x6ab   :  { %3241 = vrcp.f32 %v605_v51 }
 0x6ac   :  { %3243 = vrcp.f32 %v606_v52 }
 0x6b8   :  { %v3242_v53 = vpop.eup %3241 }
 0x6b9   :  { %v3244_v55 = vpop.eup %3243  ;;  %v619_v61 = vmul.f32 %v3242_v53, %v615_v59 }
 0x6ba   :  { %v620_v62 = vmul.f32 %v3244_v55, %v616_v60 }
 0x719   :  { %v624_v54 = vpop.permute.xlu0 %623 }
 0x71a   :  { %v626_v56 = vpop.permute.xlu1 %625  ;;  %v629_v57 = vmul.f32 %v3242_v53, %v624_v54 }
 0x71b   :  { %v630_v58 = vmul.f32 %v3244_v55, %v626_v56 }
 0x71c   :  { %633 = vrot.lane.b32.xlu0 %v629_v57, %s3674_s23 }
 0x71d   :  { %635 = vrot.lane.b32.xlu1 %v630_v58, %s3674_s23 }
 0x78e   :  { %v634_v63 = vpop.permute.xlu0 %633 }
 0x78f   :  { %v636_v2 = vpop.permute.xlu1 %635  ;;  %v3932_v4 = vadd.f32 %v634_v63, %v619_v61 }
 0x790   :  { %v3934_v5 = vadd.f32 %v636_v2, %v620_v62 }
 0x791   :  { %3245 = vtanh.f32 %v3932_v4  ;;  %v757_v45 = vrot.slane %v3932_v4, 7 }
 0x792   :  { %3247 = vtanh.f32 %v3934_v5  ;;  %v758_v46 = vrot.slane %v3934_v5, 7 }
 0x79e   :  { %v3246_v7 = vpop.eup %3245 }
 0x79f   :  { %v3248_v8 = vpop.eup %3247  ;;  %645 = vrot.lane.b32.xlu0 %v3246_v7, %s3682_s0 }
 0x7a0   :  { %647 = vrot.lane.b32.xlu1 %v3248_v8, %s3682_s0 }
 0x811   :  { %v646_v10 = vpop.permute.xlu0 %645 }
 0x812   :  { %v648_v11 = vpop.permute.xlu1 %647  ;;  %v651_v13 = vmul.f32 %v3242_v53, %v646_v10 }
 0x813   :  { %v652_v16 = vmul.f32 %v3244_v55, %v648_v11 }
 0x814   :  { %v655_v19 = vrot.slane %v651_v13, 2  ;;  %v3947_v20 = vsel %vm1366_vm5, %v1364_v15, %v651_v13 }
 0x815   :  { %v656_v21 = vrot.slane %v652_v16, 1  ;;  %v3950_v22 = vsel %vm1366_vm5, %v1365_v17, %v652_v16 }
 0x817   :  { %v657_v23 = vsel %vm374_vm3, %v656_v21, %v655_v19 }
 0x818   :  { %658 = vrot.lane.b32.xlu0 %v657_v23, %s3674_s23 }
 0x88a   :  { %v659_v24 = vpop.permute.xlu0 %658 }
 0x88b   :  { %3027 = vmatmul.mubr.msk.f32.vlgmr.msra.gmra.mxu0 %vm227_vm2, %v659_v24 }
 0x88c   :  { %3041 = vmatpush3.msra.mxu0 %v3799_v1  ;;  %3048 = vmatprep.mubr.msk.f32.mxu0 %vm3681_vm0, %v3680_v0 }
 0x88d   :  { %3042 = vmatprep.subr.mxu0 %v3680_v0 }
 0x88e   :  { %3043 = vmatpush3.msra.mxu0 %v3804_v3 }
 0x88f   :  { %3044 = vmatprep.subr.mxu0 %v3680_v0 }
 0x890   :  { %3045 = vmatpush3.msra.mxu0 %v3814_v6 }
 0x891   :  { %3046 = vmatprep.subr.mxu0 %v3680_v0 }
 0x892   :  { %3047 = vmatpush3.msra.mxu0 %v3824_v9 }
 0x893   :  { %3062 = vmatprep.subr.mxu0 %v3680_v0 }
 0x94b   :  { %v728_v47 = vpop.f32.mrf.mxu0 }
 0x94c   :  { %v733_v50 = vrot.slane %v728_v47, 5  ;;  %v734_v25 = vrot.slane %v728_v47, 6 }
 0x94d   :  { %v3028_v26 = vpop.f32.mrf.mxu0 }
 0x94e   :  { %v737_v27 = vadd.f32 %v733_v50, %v3858_v14  ;;  %v738_v28 = vadd.f32 %v3856_v12, %v734_v25 }
 0x950   :  { %v739_v29 = vadd.f32 %v3861_v18, %v737_v27  ;;  %v740_v30 = vadd.f32 %v3861_v18, %v738_v28 }
 0x952   :  { %3249 = vtanh.f32 %v739_v29  ;;  %v2838_v33 = vmul.f32 -1.442695, %v739_v29  ;;  %v2839_v34 = vmul.f32 -1.442695, %v740_v30 }
 0x953   :  { %3251 = vtanh.f32 %v740_v30 }
 0x954   :  { %3253 = vpow2.f32 %v2838_v33 }
 0x955   :  { %3255 = vpow2.f32 %v2839_v34 }
 0x95f   :  { %v3250_v31 = vpop.eup %3249 }
 0x960   :  { %v3252_v32 = vpop.eup %3251  ;;  %765 = vrot.lane.b32.xlu1 %v3250_v31, %s3682_s0 }
 0x961   :  { %767 = vrot.lane.b32.xlu0 %v3252_v32, %s3682_s0  ;;  %v3254_v35 = vpop.eup %3253 }
 0x962   :  { %v3256_v36 = vpop.eup %3255  ;;  %v747_v37 = vadd.f32 1.0, %v3254_v35 }
 0x963   :  { %v748_v38 = vadd.f32 1.0, %v3256_v36 }
 0x964   :  { %3257 = vrcp.f32 %v747_v37 }
 0x965   :  { %3259 = vrcp.f32 %v748_v38 }
 0x971   :  { %v3258_v39 = vpop.eup %3257 }
 0x972   :  { %v3260_v41 = vpop.eup %3259  ;;  %v761_v48 = vmul.f32 %v3258_v39, %v757_v45 }
 0x973   :  { %v762_v49 = vmul.f32 %v3260_v41, %v758_v46 }
 0x9d2   :  { %v766_v40 = vpop.permute.xlu1 %765 }
 0x9d3   :  { %v768_v42 = vpop.permute.xlu0 %767  ;;  %v771_v43 = vmul.f32 %v3258_v39, %v766_v40 }
 0x9d4   :  { %v772_v44 = vmul.f32 %v3260_v41, %v768_v42 }
 0x9d5   :  { %775 = vrot.lane.b32.xlu1 %v771_v43, %s3674_s23 }
 0x9d6   :  { %777 = vrot.lane.b32.xlu0 %v772_v44, %s3674_s23 }
 0xa47   :  { %v776_v51 = vpop.permute.xlu1 %775 }
 0xa48   :  { %v778_v52 = vpop.permute.xlu0 %777  ;;  %v3975_v53 = vadd.f32 %v776_v51, %v761_v48 }
 0xa49   :  { %v3977_v54 = vadd.f32 %v778_v52, %v762_v49 }
 0xa4a   :  { %3261 = vtanh.f32 %v3975_v53  ;;  %v899_v31 = vrot.slane %v3975_v53, 7 }
 0xa4b   :  { %3263 = vtanh.f32 %v3977_v54  ;;  %v900_v32 = vrot.slane %v3977_v54, 7 }
 0xa57   :  { %v3262_v55 = vpop.eup %3261 }
 0xa58   :  { %v3264_v56 = vpop.eup %3263  ;;  %787 = vrot.lane.b32.xlu1 %v3262_v55, %s3682_s0 }
 0xa59   :  { %789 = vrot.lane.b32.xlu0 %v3264_v56, %s3682_s0 }
 0xaca   :  { %v788_v57 = vpop.permute.xlu1 %787 }
 0xacb   :  { %v790_v58 = vpop.permute.xlu0 %789  ;;  %v793_v59 = vmul.f32 %v3258_v39, %v788_v57 }
 0xacc   :  { %v794_v60 = vmul.f32 %v3260_v41, %v790_v58 }
 0xacd   :  { %v797_v61 = vrot.slane %v793_v59, 3  ;;  %v3985_v62 = vsel %vm1369_vm6, %v3947_v20, %v793_v59 }
 0xace   :  { %v798_v63 = vrot.slane %v794_v60, 2  ;;  %v3989_v2 = vsel %vm1369_vm6, %v3950_v22, %v794_v60 }
 0xad0   :  { %v799_v4 = vsel %vm374_vm3, %v798_v63, %v797_v61 }
 0xad1   :  { %800 = vrot.lane.b32.xlu1 %v799_v4, %s3674_s23 }
 0xb43   :  { %v801_v5 = vpop.permute.xlu1 %800 }
 0xb44   :  { %3038 = vmatmul.mubr.msk.f32.vlgmr.msra.gmra.mxu1 %vm227_vm2, %v801_v5 }
 0xb45   :  { %3052 = vmatpush3.msra.mxu1 %v3799_v1  ;;  %3059 = vmatprep.mubr.msk.f32.mxu1 %vm3681_vm0, %v3680_v0 }
 0xb46   :  { %3053 = vmatprep.subr.mxu1 %v3680_v0 }
 0xb47   :  { %3054 = vmatpush3.msra.mxu1 %v3804_v3 }
 0xb48   :  { %3055 = vmatprep.subr.mxu1 %v3680_v0 }
 0xb49   :  { %3056 = vmatpush3.msra.mxu1 %v3814_v6 }
 0xb4a   :  { %3057 = vmatprep.subr.mxu1 %v3680_v0 }
 0xb4b   :  { %3058 = vmatpush3.msra.mxu1 %v3824_v9 }
 0xc04   :  { %v870_v7 = vpop.f32.mrf.mxu1 }
 0xc05   :  { %v875_v8 = vrot.slane %v870_v7, 4  ;;  %v876_v10 = vrot.slane %v870_v7, 5 }
 0xc06   :  { %v3039_v11 = vpop.f32.mrf.mxu1 }
 0xc07   :  { %v879_v13 = vadd.f32 %v875_v8, %v3858_v14  ;;  %v880_v15 = vadd.f32 %v3856_v12, %v876_v10 }
 0xc09   :  { %v881_v16 = vadd.f32 %v3861_v18, %v879_v13  ;;  %v882_v17 = vadd.f32 %v3861_v18, %v880_v15 }
 0xc0b   :  { %3265 = vtanh.f32 %v881_v16  ;;  %v2841_v21 = vmul.f32 -1.442695, %v881_v16  ;;  %v2842_v22 = vmul.f32 -1.442695, %v882_v17 }
 0xc0c   :  { %3267 = vtanh.f32 %v882_v17 }
 0xc0d   :  { %3269 = vpow2.f32 %v2841_v21 }
 0xc0e   :  { %3271 = vpow2.f32 %v2842_v22 }
 0xc18   :  { %v3266_v19 = vpop.eup %3265 }
 0xc19   :  { %v3268_v20 = vpop.eup %3267  ;;  %907 = vrot.lane.b32.xlu0 %v3266_v19, %s3682_s0 }
 0xc1a   :  { %909 = vrot.lane.b32.xlu1 %v3268_v20, %s3682_s0  ;;  %v3270_v23 = vpop.eup %3269 }
 0xc1b   :  { %v3272_v24 = vpop.eup %3271  ;;  %v889_v47 = vadd.f32 1.0, %v3270_v23 }
 0xc1c   :  { %v890_v50 = vadd.f32 1.0, %v3272_v24 }
 0xc1d   :  { %3273 = vrcp.f32 %v889_v47 }
 0xc1e   :  { %3275 = vrcp.f32 %v890_v50 }
 0xc2a   :  { %v3274_v25 = vpop.eup %3273 }
 0xc2b   :  { %v3276_v27 = vpop.eup %3275  ;;  %v903_v33 = vmul.f32 %v3274_v25, %v899_v31 }
 0xc2c   :  { %v904_v34 = vmul.f32 %v3276_v27, %v900_v32 }
 0xc8b   :  { %v908_v26 = vpop.permute.xlu0 %907 }
 0xc8c   :  { %v910_v28 = vpop.permute.xlu1 %909  ;;  %v913_v29 = vmul.f32 %v3274_v25, %v908_v26 }
 0xc8d   :  { %v914_v30 = vmul.f32 %v3276_v27, %v910_v28 }
 0xc8e   :  { %917 = vrot.lane.b32.xlu0 %v913_v29, %s3674_s23 }
 0xc8f   :  { %919 = vrot.lane.b32.xlu1 %v914_v30, %s3674_s23 }
 0xd00   :  { %v918_v35 = vpop.permute.xlu0 %917 }
 0xd01   :  { %v920_v36 = vpop.permute.xlu1 %919  ;;  %v4013_v37 = vadd.f32 %v918_v35, %v903_v33 }
 0xd02   :  { %v4015_v38 = vadd.f32 %v920_v36, %v904_v34 }
 0xd03   :  { %3277 = vtanh.f32 %v4013_v37  ;;  %v1041_v13 = vrot.slane %v4013_v37, 7 }
 0xd04   :  { %3279 = vtanh.f32 %v4015_v38  ;;  %v1042_v15 = vrot.slane %v4015_v38, 7 }
 0xd10   :  { %v3278_v39 = vpop.eup %3277 }
 0xd11   :  { %v3280_v40 = vpop.eup %3279  ;;  %929 = vrot.lane.b32.xlu0 %v3278_v39, %s3682_s0 }
 0xd12   :  { %931 = vrot.lane.b32.xlu1 %v3280_v40, %s3682_s0 }
 0xd83   :  { %v930_v41 = vpop.permute.xlu0 %929 }
 0xd84   :  { %v932_v42 = vpop.permute.xlu1 %931  ;;  %v935_v43 = vmul.f32 %v3274_v25, %v930_v41 }
 0xd85   :  { %v936_v44 = vmul.f32 %v3276_v27, %v932_v42 }
 0xd86   :  { %v939_v45 = vrot.slane %v935_v43, 4  ;;  %v4023_v46 = vsel %vm1372_vm7, %v3985_v62, %v935_v43 }
 0xd87   :  { %v940_v48 = vrot.slane %v936_v44, 3  ;;  %v4027_v49 = vsel %vm1372_vm7, %v3989_v2, %v936_v44 }
 0xd89   :  { %v941_v51 = vsel %vm374_vm3, %v940_v48, %v939_v45 }
 0xd8a   :  { %942 = vrot.lane.b32.xlu0 %v941_v51, %s3674_s23 }
 0xdfc   :  { %v943_v52 = vpop.permute.xlu0 %942 }
 0xdfd   :  { %3049 = vmatmul.mubr.msk.f32.vlgmr.msra.gmra.mxu0 %vm227_vm2, %v943_v52 }
 0xdfe   :  { %3063 = vmatpush3.msra.mxu0 %v3799_v1  ;;  %3070 = vmatprep.mubr.msk.f32.mxu0 %vm3681_vm0, %v3680_v0 }
 0xdff   :  { %3064 = vmatprep.subr.mxu0 %v3680_v0 }
 0xe00   :  { %3065 = vmatpush3.msra.mxu0 %v3804_v3 }
 0xe01   :  { %3066 = vmatprep.subr.mxu0 %v3680_v0 }
 0xe02   :  { %3067 = vmatpush3.msra.mxu0 %v3814_v6 }
 0xe03   :  { %3068 = vmatprep.subr.mxu0 %v3680_v0 }
 0xe04   :  { %3069 = vmatpush3.msra.mxu0 %v3824_v9 }
 0xe05   :  { %3084 = vmatprep.subr.mxu0 %v3680_v0 }
 0xebd   :  { %v1012_v53 = vpop.f32.mrf.mxu0 }
 0xebe   :  { %v1017_v54 = vrot.slane %v1012_v53, 3  ;;  %v1018_v1 = vrot.slane %v1012_v53, 4 }
 0xebf   :  { %v3050_v55 = vpop.f32.mrf.mxu0 }
 0xec0   :  { %v1021_v56 = vadd.f32 %v1017_v54, %v3858_v14  ;;  %v1022_v57 = vadd.f32 %v3856_v12, %v1018_v1 }
 0xec2   :  { %v1023_v3 = vadd.f32 %v3861_v18, %v1021_v56  ;;  %v1024_v58 = vadd.f32 %v3861_v18, %v1022_v57 }
 0xec4   :  { %3281 = vtanh.f32 %v1023_v3  ;;  %v2844_v9 = vmul.f32 -1.442695, %v1023_v3  ;;  %v2845_v60 = vmul.f32 -1.442695, %v1024_v58 }
 0xec5   :  { %3283 = vtanh.f32 %v1024_v58 }
 0xec6   :  { %3285 = vpow2.f32 %v2844_v9 }
 0xec7   :  { %3287 = vpow2.f32 %v2845_v60 }
 0xed1   :  { %v3282_v6 = vpop.eup %3281 }
 0xed2   :  { %v3284_v59 = vpop.eup %3283  ;;  %1049 = vrot.lane.b32.xlu1 %v3282_v6, %s3682_s0 }
 0xed3   :  { %1051 = vrot.lane.b32.xlu0 %v3284_v59, %s3682_s0  ;;  %v3286_v61 = vpop.eup %3285 }
 0xed4   :  { %v3288_v62 = vpop.eup %3287  ;;  %v1031_v63 = vadd.f32 1.0, %v3286_v61 }
 0xed5   :  { %v1032_v2 = vadd.f32 1.0, %v3288_v62 }
 0xed6   :  { %3289 = vrcp.f32 %v1031_v63 }
 0xed7   :  { %3291 = vrcp.f32 %v1032_v2 }
 0xee3   :  { %v3290_v4 = vpop.eup %3289 }
 0xee4   :  { %v3292_v7 = vpop.eup %3291  ;;  %v1045_v16 = vmul.f32 %v3290_v4, %v1041_v13 }
 0xee5   :  { %v1046_v17 = vmul.f32 %v3292_v7, %v1042_v15 }
 0xf44   :  { %v1050_v5 = vpop.permute.xlu1 %1049 }
 0xf45   :  { %v1052_v8 = vpop.permute.xlu0 %1051  ;;  %v1055_v10 = vmul.f32 %v3290_v4, %v1050_v5 }
 0xf46   :  { %v1056_v11 = vmul.f32 %v3292_v7, %v1052_v8 }
 0xf47   :  { %1059 = vrot.lane.b32.xlu1 %v1055_v10, %s3674_s23 }
 0xf48   :  { %1061 = vrot.lane.b32.xlu0 %v1056_v11, %s3674_s23 }
 0xfb9   :  { %v1060_v19 = vpop.permute.xlu1 %1059 }
 0xfba   :  { %v1062_v20 = vpop.permute.xlu0 %1061  ;;  %v1065_v21 = vadd.f32 %v1060_v19, %v1045_v16 }
 0xfbb   :  { %v1066_v22 = vadd.f32 %v1062_v20, %v1046_v17 }
 0xfbc   :  { %3293 = vtanh.f32 %v1065_v21  ;;  %v1183_v56 = vrot.slane %v1065_v21, 7 }
 0xfbd   :  { %3295 = vtanh.f32 %v1066_v22  ;;  %v1184_v57 = vrot.slane %v1066_v22, 7 }
 0xfc9   :  { %v3294_v23 = vpop.eup %3293 }
 0xfca   :  { %v3296_v24 = vpop.eup %3295  ;;  %1071 = vrot.lane.b32.xlu1 %v3294_v23, %s3682_s0 }
 0xfcb   :  { %1073 = vrot.lane.b32.xlu0 %v3296_v24, %s3682_s0 }
0x103c   :  { %v1072_v47 = vpop.permute.xlu1 %1071 }
0x103d   :  { %v1074_v50 = vpop.permute.xlu0 %1073  ;;  %v1077_v25 = vmul.f32 %v3290_v4, %v1072_v47 }
0x103e   :  { %v1078_v26 = vmul.f32 %v3292_v7, %v1074_v50 }
0x103f   :  { %v1081_v27 = vrot.slane %v1077_v25, 5  ;;  %v1376_v28 = vsel %vm1375_vm8, %v4023_v46, %v1077_v25 }
0x1040   :  { %v1082_v29 = vrot.slane %v1078_v26, 4  ;;  %v1377_v30 = vsel %vm1375_vm8, %v4027_v49, %v1078_v26 }
0x1042   :  { %v1083_v31 = vsel %vm374_vm3, %v1082_v29, %v1081_v27 }
0x1043   :  { %1084 = vrot.lane.b32.xlu1 %v1083_v31, %s3674_s23 }
0x10b5   :  { %v1085_v32 = vpop.permute.xlu1 %1084 }
0x10b6   :  { %3060 = vmatmul.mubr.msk.f32.vlgmr.msra.gmra.mxu1 %vm227_vm2, %v1085_v32 }
0x1176   :  { %v1154_v33 = vpop.f32.mrf.mxu1 }
0x1177   :  { %v1159_v34 = vrot.slane %v1154_v33, 2  ;;  %v1160_v35 = vrot.slane %v1154_v33, 3 }
0x1178   :  { %v3061_v36 = vpop.f32.mrf.mxu1 }
0x1179   :  { %v1163_v37 = vadd.f32 %v1159_v34, %v3858_v14  ;;  %v1164_v38 = vadd.f32 %v3856_v12, %v1160_v35 }
0x117b   :  { %v1165_v39 = vadd.f32 %v3861_v18, %v1163_v37  ;;  %v1166_v40 = vadd.f32 %v3861_v18, %v1164_v38 }
0x117d   :  { %3297 = vtanh.f32 %v1165_v39  ;;  %v2847_v43 = vmul.f32 -1.442695, %v1165_v39  ;;  %v2848_v44 = vmul.f32 -1.442695, %v1166_v40 }
0x117e   :  { %3299 = vtanh.f32 %v1166_v40 }
0x117f   :  { %3301 = vpow2.f32 %v2847_v43  ;;  %v4098_v43 = vld [vmem:[#allocation8 + $0x10] sm:$0xff] }
0x1180   :  { %3303 = vpow2.f32 %v2848_v44  ;;  %v1387_v44 = vld [vmem:[#allocation7 + $0x18] sm:$0xff] }
0x1181   :  { %3073 = vmatprep.subr.mxu1 %v1387_v44 }
0x1182   :  { %3074 = vmatpush3.msra.mxu1 %v1387_v44 }
0x118a   :  { %v3298_v41 = vpop.eup %3297 }
0x118b   :  { %v3300_v42 = vpop.eup %3299  ;;  %1191 = vrot.lane.b32.xlu0 %v3298_v41, %s3682_s0 }
0x118c   :  { %1193 = vrot.lane.b32.xlu1 %v3300_v42, %s3682_s0  ;;  %v3302_v45 = vpop.eup %3301  ;;  %v4096_v42 = vld [vmem:[#allocation8 + $0x18] sm:$0xff] }
0x118d   :  { %v3304_v46 = vpop.eup %3303  ;;  %v1173_v48 = vadd.f32 1.0, %v3302_v45  ;;  %v1386_v45 = vld [vmem:[#allocation7 + $0x10] sm:$0xff] }
0x118e   :  { %v1174_v49 = vadd.f32 1.0, %v3304_v46  ;;  %v4102_v46 = vld [vmem:[#allocation8 + $0x8] sm:$0xff]  ;;  %3075 = vmatprep.subr.mxu1 %v1386_v45 }
0x118f   :  { %3305 = vrcp.f32 %v1173_v48  ;;  %v1385_v48 = vld [vmem:[#allocation7 + $0x8] sm:$0xff]  ;;  %3076 = vmatpush3.msra.mxu1 %v1386_v45 }
0x1190   :  { %3307 = vrcp.f32 %v1174_v49  ;;  %v4106_v49 = vld [vmem:[#allocation8] sm:$0xff]  ;;  %3077 = vmatprep.subr.mxu1 %v1385_v48 }
0x1191   :  { %3078 = vmatpush3.msra.mxu1 %v1385_v48 }
0x119c   :  { %v3306_v51 = vpop.eup %3305 }
0x119d   :  { %v3308_v53 = vpop.eup %3307  ;;  %v1187_v3 = vmul.f32 %v3306_v51, %v1183_v56 }
0x119e   :  { %v1188_v58 = vmul.f32 %v3308_v53, %v1184_v57 }
0x11fd   :  { %v1192_v52 = vpop.permute.xlu0 %1191 }
0x11fe   :  { %v1194_v54 = vpop.permute.xlu1 %1193  ;;  %v1197_v1 = vmul.f32 %v3306_v51, %v1192_v52  ;;  %v1479_v52 = vld [vmem:[#allocation11 + $0x2] sm:$0x3] }
0x11ff   :  { %v1198_v55 = vmul.f32 %v3308_v53, %v1194_v54 }
0x1200   :  { %1201 = vrot.lane.b32.xlu0 %v1197_v1, %s3674_s23 }
0x1201   :  { %1203 = vrot.lane.b32.xlu1 %v1198_v55, %s3674_s23 }
0x1272   :  { %v1202_v6 = vpop.permute.xlu0 %1201 }
0x1273   :  { %v1204_v59 = vpop.permute.xlu1 %1203  ;;  %v1207_v9 = vadd.f32 %v1202_v6, %v1187_v3 }
0x1274   :  { %v1208_v60 = vadd.f32 %v1204_v59, %v1188_v58 }
0x1275   :  { %3309 = vtanh.f32 %v1207_v9  ;;  %v1325_v34 = vrot.slane %v1207_v9, 7 }
0x1276   :  { %3311 = vtanh.f32 %v1208_v60  ;;  %v1326_v35 = vrot.slane %v1208_v60, 7 }
0x1282   :  { %v3310_v61 = vpop.eup %3309 }
0x1283   :  { %v3312_v62 = vpop.eup %3311  ;;  %1213 = vrot.lane.b32.xlu0 %v3310_v61, %s3682_s0 }
0x1284   :  { %1215 = vrot.lane.b32.xlu1 %v3312_v62, %s3682_s0 }
0x12f5   :  { %v1214_v63 = vpop.permute.xlu0 %1213 }
0x12f6   :  { %v1216_v2 = vpop.permute.xlu1 %1215  ;;  %v1219_v4 = vmul.f32 %v3306_v51, %v1214_v63  ;;  %v1384_v51 = vld [vmem:[#allocation7] sm:$0xff] }
0x12f7   :  { %v1220_v5 = vmul.f32 %v3308_v53, %v1216_v2  ;;  %3079 = vmatprep.subr.mxu1 %v1384_v51  ;;  %v4152_v63 = vld [vmem:[#allocation10] ss:$0 sm:$0xff] }
0x12f8   :  { %v1223_v7 = vrot.slane %v1219_v4, 6  ;;  %v4072_v8 = vsel %vm1378_vm9, %v1376_v28, %v1219_v4  ;;  %3080 = vmatpush3.msra.mxu1 %v1384_v51 }
0x12f9   :  { %v1224_v10 = vrot.slane %v1220_v5, 5  ;;  %v4075_v11 = vsel %vm1378_vm9, %v1377_v30, %v1220_v5  ;;  %3095 = vmatprep.subr.mxu1 %v3680_v0 }
0x12fb   :  { %v1225_v13 = vsel %vm374_vm3, %v1224_v10, %v1223_v7  ;;  %v1481_v10 = vld [vmem:[#allocation13 + $0x2] sm:$0x3] }
0x12fc   :  { %1226 = vrot.lane.b32.xlu0 %v1225_v13, %s3674_s23  ;;  %v1584_v13 = vrot.slane %v1481_v10, 1 }
0x136e   :  { %v1227_v15 = vpop.permute.xlu0 %1226 }
0x136f   :  { %3071 = vmatmul.mubr.msk.f32.vlgmr.msra.gmra.mxu0 %vm227_vm2, %v1227_v15 }
0x1370   :  { %3092 = vmatprep.mubr.msk.f32.mxu0 %vm3681_vm0, %v3680_v0  ;;  %3085 = vmatpush3.msra.mxu0 %v4096_v42 }
0x1371   :  { %3086 = vmatprep.subr.mxu0 %v3680_v0 }
0x1372   :  { %3087 = vmatpush3.msra.mxu0 %v4098_v43 }
0x1373   :  { %3088 = vmatprep.subr.mxu0 %v3680_v0 }
0x1374   :  { %3089 = vmatpush3.msra.mxu0 %v4102_v46 }
0x1375   :  { %3090 = vmatprep.subr.mxu0 %v3680_v0 }
0x1376   :  { %3091 = vmatpush3.msra.mxu0 %v4106_v49 }
0x1377   :  { %3093 = vmatmul.mubr.msk.f32.vlgmr.msra.gmra.mxu0 %vm227_vm2, %v1479_v52  ;;  %3106 = vmatprep.subr.mxu0 %v3680_v0 }
0x1378   :  { %3107 = vmatpush3.msra.mxu0 %v4096_v42  ;;  %3114 = vmatprep.mubr.msk.f32.mxu0 %vm3681_vm0, %v3680_v0 }
0x1379   :  { %3108 = vmatprep.subr.mxu0 %v3680_v0 }
0x137a   :  { %3109 = vmatpush3.msra.mxu0 %v4098_v43 }
0x137b   :  { %3110 = vmatprep.subr.mxu0 %v3680_v0 }
0x137c   :  { %3111 = vmatpush3.msra.mxu0 %v4102_v46 }
0x137d   :  { %3112 = vmatprep.subr.mxu0 %v3680_v0 }
0x137e   :  { %3113 = vmatpush3.msra.mxu0 %v4106_v49 }
0x137f   :  { %3128 = vmatprep.subr.mxu0 %v3680_v0 }
0x142f   :  { %v1296_v16 = vpop.f32.mrf.mxu0 }
0x1430   :  { %v1301_v17 = vrot.slane %v1296_v16, 1  ;;  %v1302_v19 = vrot.slane %v1296_v16, 2 }
0x1431   :  { %v3072_v20 = vpop.f32.mrf.mxu0 }
0x1432   :  { %v1305_v21 = vadd.f32 %v1301_v17, %v3858_v14  ;;  %v1306_v22 = vadd.f32 %v3856_v12, %v1302_v19 }
0x1434   :  { %v1307_v23 = vadd.f32 %v3861_v18, %v1305_v21  ;;  %v1308_v24 = vadd.f32 %v3861_v18, %v1306_v22 }
0x1436   :  { %3313 = vtanh.f32 %v1307_v23  ;;  %v2850_v25 = vmul.f32 -1.442695, %v1307_v23  ;;  %v2851_v26 = vmul.f32 -1.442695, %v1308_v24 }
0x1437   :  { %3315 = vtanh.f32 %v1308_v24  ;;  %v1551_v6 = vpop.f32.mrf.mxu0 }
0x1438   :  { %3317 = vpow2.f32 %v2850_v25  ;;  %v1556_v61 = vrot.slane %v1551_v6, 1 }
0x1439   :  { %3319 = vpow2.f32 %v2851_v26  ;;  %v3094_v59 = vpop.f32.mrf.mxu0 }
0x1443   :  { %v3314_v47 = vpop.eup %3313 }
0x1444   :  { %v3316_v50 = vpop.eup %3315  ;;  %1333 = vrot.lane.b32.xlu1 %v3314_v47, %s3682_s0 }
0x1445   :  { %1335 = vrot.lane.b32.xlu0 %v3316_v50, %s3682_s0  ;;  %v3318_v27 = vpop.eup %3317 }
0x1446   :  { %v3320_v14 = vpop.eup %3319  ;;  %v1315_v28 = vadd.f32 1.0, %v3318_v27 }
0x1447   :  { %v1316_v12 = vadd.f32 1.0, %v3320_v14 }
0x1448   :  { %3321 = vrcp.f32 %v1315_v28 }
0x1449   :  { %3323 = vrcp.f32 %v1316_v12 }
0x1455   :  { %v3322_v29 = vpop.eup %3321 }
0x1456   :  { %v3324_v30 = vpop.eup %3323  ;;  %v1329_v36 = vmul.f32 %v3322_v29, %v1325_v34 }
0x1457   :  { %v1330_v37 = vmul.f32 %v3324_v30, %v1326_v35 }
0x14b6   :  { %v1334_v18 = vpop.permute.xlu1 %1333 }
0x14b7   :  { %v1336_v31 = vpop.permute.xlu0 %1335  ;;  %v1339_v32 = vmul.f32 %v3322_v29, %v1334_v18 }
0x14b8   :  { %v1340_v33 = vmul.f32 %v3324_v30, %v1336_v31 }
0x14b9   :  { %1343 = vrot.lane.b32.xlu1 %v1339_v32, %s3674_s23 }
0x14ba   :  { %1345 = vrot.lane.b32.xlu0 %v1340_v33, %s3674_s23 }
0x152b   :  { %v1344_v38 = vpop.permute.xlu1 %1343 }
0x152c   :  { %v1346_v39 = vpop.permute.xlu0 %1345  ;;  %v4090_v40 = vadd.f32 %v1344_v38, %v1329_v36 }
0x152d   :  { %v4092_v41 = vadd.f32 %v1346_v39, %v1330_v37 }
0x152e   :  { %3325 = vtanh.f32 %v4090_v40 }
0x152f   :  { %3327 = vtanh.f32 %v4092_v41 }
0x153b   :  { %v3326_v53 = vpop.eup %3325 }
0x153c   :  { %v3328_v54 = vpop.eup %3327  ;;  %1355 = vrot.lane.b32.xlu1 %v3326_v53, %s3682_s0 }
0x153d   :  { %1357 = vrot.lane.b32.xlu0 %v3328_v54, %s3682_s0 }
0x15ae   :  { %v1356_v1 = vpop.permute.xlu1 %1355 }
0x15af   :  { %v1358_v55 = vpop.permute.xlu0 %1357  ;;  %v4126_v56 = vmul.f32 %v3322_v29, %v1356_v1 }
0x15b0   :  { %v4128_v57 = vmul.f32 %v3324_v30, %v1358_v55 }
0x15b1   :  { %v1382_v3 = vsel %vm1381_vm10, %v4072_v8, %v4126_v56 }
0x15b2   :  { %v1383_v58 = vsel %vm1381_vm10, %v4075_v11, %v4128_v57  ;;  %1390 = vrot.lane.b32.xlu1 %v1382_v3, %s3674_s23 }
0x15b3   :  { %1392 = vrot.lane.b32.xlu0 %v1383_v58, %s3674_s23 }
0x1624   :  { %v1391_v9 = vpop.permute.xlu1 %1390 }
0x1625   :  { %v1393_v60 = vpop.permute.xlu0 %1392  ;;  %3081 = vmatprep.mubr.msk.f32.mxu1 %vm227_vm2, %v1391_v9 }
0x1626   :  { %3082 = vmatmul.mubr.msk.f32.vlgmr.msra.gmra.mxu1 %vm227_vm2, %v1393_v60 }
0x1627   :  { %3096 = vmatpush3.msra.mxu1 %v4096_v42  ;;  %3103 = vmatprep.mubr.msk.f32.mxu1 %vm3681_vm0, %v3680_v0 }
0x1628   :  { %3097 = vmatprep.subr.mxu1 %v3680_v0 }
0x1629   :  { %3098 = vmatpush3.msra.mxu1 %v4098_v43 }
0x162a   :  { %3099 = vmatprep.subr.mxu1 %v3680_v0 }
0x162b   :  { %3100 = vmatpush3.msra.mxu1 %v4102_v46 }
0x162c   :  { %3101 = vmatprep.subr.mxu1 %v3680_v0 }
0x162d   :  { %3102 = vmatpush3.msra.mxu1 %v4106_v49 }
0x162e   :  { %3117 = vmatprep.subr.mxu1 %v3680_v0 }
0x16e6   :  { %v4150_v62 = vpop.f32.mrf.mxu1 }
0x16e7   :  { %v1560_v2 = vadd.f32 %v4150_v62, %v1556_v61 }
0x16e8   :  { %v4155_v4 = vpop.f32.mrf.mxu1 }
0x16e9   :  { %v1568_v5 = vadd.f32 %v4152_v63, %v1560_v2  ;;  %v1559_v7 = vadd.f32 %v1551_v6, %v4155_v4 }
0x16eb   :  { %3329 = vtanh.f32 %v1568_v5  ;;  %v1567_v8 = vadd.f32 %v4152_v63, %v1559_v7  ;;  %v2857_v16 = vmul.f32 -1.442695, %v1568_v5 }
0x16ed   :  { %3331 = vtanh.f32 %v1567_v8  ;;  %v2856_v17 = vmul.f32 -1.442695, %v1567_v8 }
0x16ee   :  { %3333 = vpow2.f32 %v2857_v16 }
0x16ef   :  { %3335 = vpow2.f32 %v2856_v17 }
0x16f8   :  { %v3330_v11 = vpop.eup %3329 }
0x16f9   :  { %1597 = vrot.lane.b32.xlu1 %v3330_v11, %s3682_s0 }
0x16fa   :  { %v3332_v15 = vpop.eup %3331 }
0x16fb   :  { %1595 = vrot.lane.b32.xlu0 %v3332_v15, %s3682_s0  ;;  %v3334_v19 = vpop.eup %3333 }
0x16fc   :  { %v3336_v20 = vpop.eup %3335  ;;  %v1576_v21 = vadd.f32 1.0, %v3334_v19 }
0x16fd   :  { %1587 = vrot.lane.b32.xlu1 %v1584_v13, %s3674_s23  ;;  %v1575_v22 = vadd.f32 1.0, %v3336_v20 }
0x16fe   :  { %3337 = vrcp.f32 %v1576_v21 }
0x16ff   :  { %1585 = vrot.lane.b32.xlu0 %v1481_v10, %s3674_s23  ;;  %3339 = vrcp.f32 %v1575_v22 }
0x170b   :  { %v3338_v23 = vpop.eup %3337 }
0x170c   :  { %v3340_v50 = vpop.eup %3339 }
0x176b   :  { %v1598_v24 = vpop.permute.xlu1 %1597 }
0x176c   :  { %v1602_v47 = vmul.f32 %v3338_v23, %v1598_v24 }
0x176d   :  { %v1596_v25 = vpop.permute.xlu0 %1595 }
0x176e   :  { %1607 = vrot.lane.b32.xlu1 %v1602_v47, %s3674_s23  ;;  %v1601_v26 = vmul.f32 %v3340_v50, %v1596_v25 }
0x176f   :  { %v1588_v27 = vpop.permute.xlu1 %1587 }
0x1770   :  { %1605 = vrot.lane.b32.xlu0 %v1601_v26, %s3674_s23  ;;  %v1592_v14 = vmul.f32 %v3338_v23, %v1588_v27 }
0x1771   :  { %v1586_v28 = vpop.permute.xlu0 %1585 }
0x1772   :  { %v1591_v18 = vmul.f32 %v3340_v50, %v1586_v28 }
0x17e0   :  { %v1608_v12 = vpop.permute.xlu1 %1607 }
0x17e1   :  { %v1612_v29 = vadd.f32 %v1608_v12, %v1592_v14 }
0x17e2   :  { %v1606_v30 = vpop.permute.xlu0 %1605 }
0x17e3   :  { %3341 = vtanh.f32 %v1612_v29  ;;  %v1611_v31 = vadd.f32 %v1606_v30, %v1591_v18  ;;  %v1728_v13 = vrot.slane %v1612_v29, 7 }
0x17e5   :  { %3343 = vtanh.f32 %v1611_v31  ;;  %v1727_v16 = vrot.slane %v1611_v31, 7 }
0x17f0   :  { %v3342_v32 = vpop.eup %3341 }
0x17f1   :  { %1619 = vrot.lane.b32.xlu1 %v3342_v32, %s3682_s0 }
0x17f2   :  { %v3344_v33 = vpop.eup %3343 }
0x17f3   :  { %1617 = vrot.lane.b32.xlu0 %v3344_v33, %s3682_s0 }
0x1863   :  { %v1620_v34 = vpop.permute.xlu1 %1619 }
0x1864   :  { %v4168_v35 = vmul.f32 %v3338_v23, %v1620_v34 }
0x1865   :  { %v1618_v37 = vpop.permute.xlu0 %1617 }
0x1866   :  { %v1627_v36 = vrot.slane %v4168_v35, 7  ;;  %v4171_v38 = vmul.f32 %v3340_v50, %v1618_v37 }
0x1868   :  { %v1628_v39 = vsel %vm374_vm3, %v1627_v36, %v4171_v38 }
0x1869   :  { %1629 = vrot.lane.b32.xlu1 %v1628_v39, %s3674_s23 }
0x18db   :  { %v1630_v44 = vpop.permute.xlu1 %1629 }
0x18dc   :  { %3104 = vmatmul.mubr.msk.f32.vlgmr.msra.gmra.mxu1 %vm227_vm2, %v1630_v44 }
0x18dd   :  { %3118 = vmatpush3.msra.mxu1 %v4096_v42  ;;  %3125 = vmatprep.mubr.msk.f32.mxu1 %vm3681_vm0, %v3680_v0 }
0x18de   :  { %3119 = vmatprep.subr.mxu1 %v3680_v0 }
0x18df   :  { %3120 = vmatpush3.msra.mxu1 %v4098_v43 }
0x18e0   :  { %3121 = vmatprep.subr.mxu1 %v3680_v0 }
0x18e1   :  { %3122 = vmatpush3.msra.mxu1 %v4102_v46 }
0x18e2   :  { %3123 = vmatprep.subr.mxu1 %v3680_v0 }
0x18e3   :  { %3124 = vmatpush3.msra.mxu1 %v4106_v49 }
0x18e4   :  { %3139 = vmatprep.subr.mxu1 %v3680_v0 }
0x199c   :  { %v1699_v45 = vpop.f32.mrf.mxu1 }
0x199d   :  { %v1704_v48 = vrot.slane %v1699_v45, 7  ;;  %v1708_v51 = vadd.f32 %v4150_v62, %v1699_v45 }
0x199e   :  { %v3105_v52 = vpop.f32.mrf.mxu1 }
0x199f   :  { %v1707_v53 = vadd.f32 %v1704_v48, %v4155_v4  ;;  %v1710_v54 = vadd.f32 %v4152_v63, %v1708_v51 }
0x19a1   :  { %v1709_v1 = vadd.f32 %v4152_v63, %v1707_v53  ;;  %3345 = vtanh.f32 %v1710_v54  ;;  %v2860_v58 = vmul.f32 -1.442695, %v1710_v54 }
0x19a3   :  { %3347 = vtanh.f32 %v1709_v1  ;;  %v2859_v6 = vmul.f32 -1.442695, %v1709_v1 }
0x19a4   :  { %3349 = vpow2.f32 %v2860_v58 }
0x19a5   :  { %3351 = vpow2.f32 %v2859_v6 }
0x19ae   :  { %v3346_v55 = vpop.eup %3345 }
0x19af   :  { %1737 = vrot.lane.b32.xlu1 %v3346_v55, %s3682_s0 }
0x19b0   :  { %v3348_v3 = vpop.eup %3347 }
0x19b1   :  { %1735 = vrot.lane.b32.xlu0 %v3348_v3, %s3682_s0  ;;  %v3350_v59 = vpop.eup %3349 }
0x19b2   :  { %v3352_v9 = vpop.eup %3351  ;;  %v1718_v60 = vadd.f32 1.0, %v3350_v59 }
0x19b3   :  { %v1717_v61 = vadd.f32 1.0, %v3352_v9 }
0x19b4   :  { %3353 = vrcp.f32 %v1718_v60 }
0x19b5   :  { %3355 = vrcp.f32 %v1717_v61 }
0x19c1   :  { %v3354_v2 = vpop.eup %3353 }
0x19c2   :  { %v3356_v8 = vpop.eup %3355  ;;  %v1732_v15 = vmul.f32 %v3354_v2, %v1728_v13 }
0x19c3   :  { %v1731_v20 = vmul.f32 %v3356_v8, %v1727_v16 }
0x1a21   :  { %v1738_v5 = vpop.permute.xlu1 %1737 }
0x1a22   :  { %v1742_v7 = vmul.f32 %v3354_v2, %v1738_v5 }
0x1a23   :  { %v1736_v10 = vpop.permute.xlu0 %1735 }
0x1a24   :  { %1747 = vrot.lane.b32.xlu1 %v1742_v7, %s3674_s23  ;;  %v1741_v11 = vmul.f32 %v3356_v8, %v1736_v10 }
0x1a26   :  { %1745 = vrot.lane.b32.xlu0 %v1741_v11, %s3674_s23 }
0x1a96   :  { %v1748_v17 = vpop.permute.xlu1 %1747 }
0x1a97   :  { %v4195_v19 = vadd.f32 %v1748_v17, %v1732_v15 }
0x1a98   :  { %v1746_v21 = vpop.permute.xlu0 %1745 }
0x1a99   :  { %3357 = vtanh.f32 %v4195_v19  ;;  %v1751_v22 = vadd.f32 %v1746_v21, %v1731_v20  ;;  %v1869_v59 = vrot.slane %v4195_v19, 7 }
0x1a9b   :  { %3359 = vtanh.f32 %v1751_v22  ;;  %v1868_v6 = vrot.slane %v1751_v22, 7 }
0x1aa6   :  { %v3358_v23 = vpop.eup %3357 }
0x1aa7   :  { %1759 = vrot.lane.b32.xlu1 %v3358_v23, %s3682_s0 }
0x1aa8   :  { %v3360_v24 = vpop.eup %3359 }
0x1aa9   :  { %1757 = vrot.lane.b32.xlu0 %v3360_v24, %s3682_s0 }
0x1b19   :  { %v1760_v47 = vpop.permute.xlu1 %1759 }
0x1b1a   :  { %v4202_v26 = vmul.f32 %v3354_v2, %v1760_v47 }
0x1b1b   :  { %v1758_v50 = vpop.permute.xlu0 %1757 }
0x1b1c   :  { %v4200_v25 = vmul.f32 %v3356_v8, %v1758_v50  ;;  %v2617_v19 = vsel %vm1363_vm4, %v4168_v35, %v4202_v26 }
0x1b1e   :  { %v1767_v27 = vrot.slane %v4200_v25, 1  ;;  %v2616_v16 = vsel %vm1363_vm4, %v4171_v38, %v4200_v25 }
0x1b20   :  { %v1768_v14 = vsel %vm374_vm3, %v4202_v26, %v1767_v27 }
0x1b21   :  { %1769 = vrot.lane.b32.xlu0 %v1768_v14, %s3674_s23 }
0x1b93   :  { %v1770_v28 = vpop.permute.xlu0 %1769 }
0x1b94   :  { %3115 = vmatmul.mubr.msk.f32.vlgmr.msra.gmra.mxu0 %vm227_vm2, %v1770_v28 }
0x1b95   :  { %3129 = vmatpush3.msra.mxu0 %v4096_v42  ;;  %3136 = vmatprep.mubr.msk.f32.mxu0 %vm3681_vm0, %v3680_v0 }
0x1b96   :  { %3130 = vmatprep.subr.mxu0 %v3680_v0 }
0x1b97   :  { %3131 = vmatpush3.msra.mxu0 %v4098_v43 }
0x1b98   :  { %3132 = vmatprep.subr.mxu0 %v3680_v0 }
0x1b99   :  { %3133 = vmatpush3.msra.mxu0 %v4102_v46 }
0x1b9a   :  { %3134 = vmatprep.subr.mxu0 %v3680_v0 }
0x1b9b   :  { %3135 = vmatpush3.msra.mxu0 %v4106_v49 }
0x1b9c   :  { %3150 = vmatprep.subr.mxu0 %v3680_v0 }
0x1c54   :  { %v1839_v12 = vpop.f32.mrf.mxu0 }
0x1c55   :  { %v1844_v29 = vrot.slane %v1839_v12, 6  ;;  %v1845_v18 = vrot.slane %v1839_v12, 7 }
0x1c56   :  { %v3116_v30 = vpop.f32.mrf.mxu0 }
0x1c57   :  { %v1848_v31 = vadd.f32 %v1844_v29, %v4155_v4  ;;  %v1849_v32 = vadd.f32 %v4150_v62, %v1845_v18 }
0x1c59   :  { %v1850_v33 = vadd.f32 %v4152_v63, %v1848_v31  ;;  %v1851_v34 = vadd.f32 %v4152_v63, %v1849_v32 }
0x1c5b   :  { %3361 = vtanh.f32 %v1850_v33  ;;  %v2862_v39 = vmul.f32 -1.442695, %v1850_v33  ;;  %v2863_v44 = vmul.f32 -1.442695, %v1851_v34 }
0x1c5c   :  { %3363 = vtanh.f32 %v1851_v34 }
0x1c5d   :  { %3365 = vpow2.f32 %v2862_v39 }
0x1c5e   :  { %3367 = vpow2.f32 %v2863_v44 }
0x1c68   :  { %v3362_v36 = vpop.eup %3361 }
0x1c69   :  { %v3364_v37 = vpop.eup %3363  ;;  %1876 = vrot.lane.b32.xlu1 %v3362_v36, %s3682_s0 }
0x1c6a   :  { %1878 = vrot.lane.b32.xlu0 %v3364_v37, %s3682_s0  ;;  %v3366_v45 = vpop.eup %3365 }
0x1c6b   :  { %v3368_v48 = vpop.eup %3367  ;;  %v1858_v51 = vadd.f32 1.0, %v3366_v45 }
0x1c6c   :  { %v1859_v52 = vadd.f32 1.0, %v3368_v48 }
0x1c6d   :  { %3369 = vrcp.f32 %v1858_v51 }
0x1c6e   :  { %3371 = vrcp.f32 %v1859_v52 }
0x1c7a   :  { %v3370_v53 = vpop.eup %3369 }
0x1c7b   :  { %v3372_v1 = vpop.eup %3371  ;;  %v1872_v9 = vmul.f32 %v3370_v53, %v1868_v6 }
0x1c7c   :  { %v1873_v60 = vmul.f32 %v3372_v1, %v1869_v59 }
0x1cdb   :  { %v1877_v54 = vpop.permute.xlu1 %1876 }
0x1cdc   :  { %v1879_v55 = vpop.permute.xlu0 %1878  ;;  %v1882_v3 = vmul.f32 %v3370_v53, %v1877_v54 }
0x1cdd   :  { %v1883_v58 = vmul.f32 %v3372_v1, %v1879_v55 }
0x1cde   :  { %1886 = vrot.lane.b32.xlu1 %v1882_v3, %s3674_s23 }
0x1cdf   :  { %1888 = vrot.lane.b32.xlu0 %v1883_v58, %s3674_s23 }
0x1d50   :  { %v1887_v61 = vpop.permute.xlu1 %1886 }
0x1d51   :  { %v1889_v2 = vpop.permute.xlu0 %1888  ;;  %v4228_v5 = vadd.f32 %v1887_v61, %v1872_v9 }
0x1d52   :  { %v4230_v7 = vadd.f32 %v1889_v2, %v1873_v60 }
0x1d53   :  { %3373 = vtanh.f32 %v4228_v5  ;;  %v2010_v51 = vrot.slane %v4228_v5, 7 }
0x1d54   :  { %3375 = vtanh.f32 %v4230_v7  ;;  %v2011_v52 = vrot.slane %v4230_v7, 7 }
0x1d60   :  { %v3374_v8 = vpop.eup %3373 }
0x1d61   :  { %v3376_v10 = vpop.eup %3375  ;;  %1898 = vrot.lane.b32.xlu1 %v3374_v8, %s3682_s0 }
0x1d62   :  { %1900 = vrot.lane.b32.xlu0 %v3376_v10, %s3682_s0 }
0x1dd3   :  { %v1899_v11 = vpop.permute.xlu1 %1898 }
0x1dd4   :  { %v1901_v13 = vpop.permute.xlu0 %1900  ;;  %v1904_v15 = vmul.f32 %v3370_v53, %v1899_v11 }
0x1dd5   :  { %v1905_v17 = vmul.f32 %v3372_v1, %v1901_v13 }
0x1dd6   :  { %v1908_v20 = vrot.slane %v1904_v15, 2  ;;  %v4243_v21 = vsel %vm1366_vm5, %v2616_v16, %v1904_v15 }
0x1dd7   :  { %v1909_v22 = vrot.slane %v1905_v17, 1  ;;  %v4246_v23 = vsel %vm1366_vm5, %v2617_v19, %v1905_v17 }
0x1dd9   :  { %v1910_v24 = vsel %vm374_vm3, %v1909_v22, %v1908_v20 }
0x1dda   :  { %1911 = vrot.lane.b32.xlu1 %v1910_v24, %s3674_s23 }
0x1e4c   :  { %v1912_v47 = vpop.permute.xlu1 %1911 }
0x1e4d   :  { %3126 = vmatmul.mubr.msk.f32.vlgmr.msra.gmra.mxu1 %vm227_vm2, %v1912_v47 }
0x1e4e   :  { %3140 = vmatpush3.msra.mxu1 %v4096_v42  ;;  %3147 = vmatprep.mubr.msk.f32.mxu1 %vm3681_vm0, %v3680_v0 }
0x1e4f   :  { %3141 = vmatprep.subr.mxu1 %v3680_v0 }
0x1e50   :  { %3142 = vmatpush3.msra.mxu1 %v4098_v43 }
0x1e51   :  { %3143 = vmatprep.subr.mxu1 %v3680_v0 }
0x1e52   :  { %3144 = vmatpush3.msra.mxu1 %v4102_v46 }
0x1e53   :  { %3145 = vmatprep.subr.mxu1 %v3680_v0 }
0x1e54   :  { %3146 = vmatpush3.msra.mxu1 %v4106_v49 }
0x1e55   :  { %3161 = vmatprep.subr.mxu1 %v3680_v0 }
0x1f0d   :  { %v1981_v35 = vpop.f32.mrf.mxu1 }
0x1f0e   :  { %v1986_v38 = vrot.slane %v1981_v35, 5  ;;  %v1987_v50 = vrot.slane %v1981_v35, 6 }
0x1f0f   :  { %v3127_v25 = vpop.f32.mrf.mxu1 }
0x1f10   :  { %v1990_v26 = vadd.f32 %v1986_v38, %v4155_v4  ;;  %v1991_v27 = vadd.f32 %v4150_v62, %v1987_v50 }
0x1f12   :  { %v1992_v14 = vadd.f32 %v4152_v63, %v1990_v26  ;;  %v1993_v28 = vadd.f32 %v4152_v63, %v1991_v27 }
0x1f14   :  { %3377 = vtanh.f32 %v1992_v14  ;;  %v2865_v18 = vmul.f32 -1.442695, %v1992_v14  ;;  %v2866_v30 = vmul.f32 -1.442695, %v1993_v28 }
0x1f15   :  { %3379 = vtanh.f32 %v1993_v28 }
0x1f16   :  { %3381 = vpow2.f32 %v2865_v18 }
0x1f17   :  { %3383 = vpow2.f32 %v2866_v30 }
0x1f21   :  { %v3378_v12 = vpop.eup %3377 }
0x1f22   :  { %v3380_v29 = vpop.eup %3379  ;;  %2018 = vrot.lane.b32.xlu0 %v3378_v12, %s3682_s0 }
0x1f23   :  { %2020 = vrot.lane.b32.xlu1 %v3380_v29, %s3682_s0  ;;  %v3382_v31 = vpop.eup %3381 }
0x1f24   :  { %v3384_v32 = vpop.eup %3383  ;;  %v2000_v33 = vadd.f32 1.0, %v3382_v31 }
0x1f25   :  { %v2001_v34 = vadd.f32 1.0, %v3384_v32 }
0x1f26   :  { %3385 = vrcp.f32 %v2000_v33 }
0x1f27   :  { %3387 = vrcp.f32 %v2001_v34 }
0x1f33   :  { %v3386_v36 = vpop.eup %3385 }
0x1f34   :  { %v3388_v39 = vpop.eup %3387  ;;  %v2014_v53 = vmul.f32 %v3386_v36, %v2010_v51 }
0x1f35   :  { %v2015_v54 = vmul.f32 %v3388_v39, %v2011_v52 }
0x1f94   :  { %v2019_v37 = vpop.permute.xlu0 %2018 }
0x1f95   :  { %v2021_v44 = vpop.permute.xlu1 %2020  ;;  %v2024_v45 = vmul.f32 %v3386_v36, %v2019_v37 }
0x1f96   :  { %v2025_v48 = vmul.f32 %v3388_v39, %v2021_v44 }
0x1f97   :  { %2028 = vrot.lane.b32.xlu0 %v2024_v45, %s3674_s23 }
0x1f98   :  { %2030 = vrot.lane.b32.xlu1 %v2025_v48, %s3674_s23 }
0x2009   :  { %v2029_v1 = vpop.permute.xlu0 %2028 }
0x200a   :  { %v2031_v55 = vpop.permute.xlu1 %2030  ;;  %v4271_v3 = vadd.f32 %v2029_v1, %v2014_v53 }
0x200b   :  { %v4273_v58 = vadd.f32 %v2031_v55, %v2015_v54 }
0x200c   :  { %3389 = vtanh.f32 %v4271_v3  ;;  %v2152_v31 = vrot.slane %v4271_v3, 7 }
0x200d   :  { %3391 = vtanh.f32 %v4273_v58  ;;  %v2153_v32 = vrot.slane %v4273_v58, 7 }
0x2019   :  { %v3390_v6 = vpop.eup %3389 }
0x201a   :  { %v3392_v59 = vpop.eup %3391  ;;  %2040 = vrot.lane.b32.xlu0 %v3390_v6, %s3682_s0 }
0x201b   :  { %2042 = vrot.lane.b32.xlu1 %v3392_v59, %s3682_s0 }
0x208c   :  { %v2041_v9 = vpop.permute.xlu0 %2040 }
0x208d   :  { %v2043_v60 = vpop.permute.xlu1 %2042  ;;  %v2046_v61 = vmul.f32 %v3386_v36, %v2041_v9 }
0x208e   :  { %v2047_v2 = vmul.f32 %v3388_v39, %v2043_v60 }
0x208f   :  { %v2050_v5 = vrot.slane %v2046_v61, 3  ;;  %v4281_v7 = vsel %vm1369_vm6, %v4243_v21, %v2046_v61 }
0x2090   :  { %v2051_v8 = vrot.slane %v2047_v2, 2  ;;  %v4285_v10 = vsel %vm1369_vm6, %v4246_v23, %v2047_v2 }
0x2092   :  { %v2052_v11 = vsel %vm374_vm3, %v2051_v8, %v2050_v5 }
0x2093   :  { %2053 = vrot.lane.b32.xlu0 %v2052_v11, %s3674_s23 }
0x2105   :  { %v2054_v13 = vpop.permute.xlu0 %2053 }
0x2106   :  { %3137 = vmatmul.mubr.msk.f32.vlgmr.msra.gmra.mxu0 %vm227_vm2, %v2054_v13 }
0x2107   :  { %3151 = vmatpush3.msra.mxu0 %v4096_v42  ;;  %3158 = vmatprep.mubr.msk.f32.mxu0 %vm3681_vm0, %v3680_v0 }
0x2108   :  { %3152 = vmatprep.subr.mxu0 %v3680_v0 }
0x2109   :  { %3153 = vmatpush3.msra.mxu0 %v4098_v43 }
0x210a   :  { %3154 = vmatprep.subr.mxu0 %v3680_v0 }
0x210b   :  { %3155 = vmatpush3.msra.mxu0 %v4102_v46 }
0x210c   :  { %3156 = vmatprep.subr.mxu0 %v3680_v0 }
0x210d   :  { %3157 = vmatpush3.msra.mxu0 %v4106_v49 }
0x21c6   :  { %v2123_v15 = vpop.f32.mrf.mxu0 }
0x21c7   :  { %v2128_v16 = vrot.slane %v2123_v15, 4  ;;  %v2129_v17 = vrot.slane %v2123_v15, 5 }
0x21c8   :  { %v3138_v19 = vpop.f32.mrf.mxu0 }
0x21c9   :  { %v2132_v20 = vadd.f32 %v2128_v16, %v4155_v4  ;;  %v2133_v21 = vadd.f32 %v4150_v62, %v2129_v17 }
0x21cb   :  { %v2134_v22 = vadd.f32 %v4152_v63, %v2132_v20  ;;  %v2135_v23 = vadd.f32 %v4152_v63, %v2133_v21 }
0x21cd   :  { %3393 = vtanh.f32 %v2134_v22  ;;  %v2868_v35 = vmul.f32 -1.442695, %v2134_v22  ;;  %v2869_v38 = vmul.f32 -1.442695, %v2135_v23 }
0x21ce   :  { %3395 = vtanh.f32 %v2135_v23 }
0x21cf   :  { %3397 = vpow2.f32 %v2868_v35 }
0x21d0   :  { %3399 = vpow2.f32 %v2869_v38 }
0x21da   :  { %v3394_v24 = vpop.eup %3393 }
0x21db   :  { %v3396_v47 = vpop.eup %3395  ;;  %2160 = vrot.lane.b32.xlu1 %v3394_v24, %s3682_s0 }
0x21dc   :  { %2162 = vrot.lane.b32.xlu0 %v3396_v47, %s3682_s0  ;;  %v3398_v50 = vpop.eup %3397 }
0x21dd   :  { %v3400_v25 = vpop.eup %3399  ;;  %v2142_v26 = vadd.f32 1.0, %v3398_v50 }
0x21de   :  { %v2143_v27 = vadd.f32 1.0, %v3400_v25 }
0x21df   :  { %3401 = vrcp.f32 %v2142_v26 }
0x21e0   :  { %3403 = vrcp.f32 %v2143_v27 }
0x21ec   :  { %v3402_v14 = vpop.eup %3401 }
0x21ed   :  { %v3404_v12 = vpop.eup %3403  ;;  %v2156_v33 = vmul.f32 %v3402_v14, %v2152_v31 }
0x21ee   :  { %v2157_v34 = vmul.f32 %v3404_v12, %v2153_v32 }
0x224d   :  { %v2161_v28 = vpop.permute.xlu1 %2160 }
0x224e   :  { %v2163_v29 = vpop.permute.xlu0 %2162  ;;  %v2166_v18 = vmul.f32 %v3402_v14, %v2161_v28 }
0x224f   :  { %v2167_v30 = vmul.f32 %v3404_v12, %v2163_v29 }
0x2250   :  { %2170 = vrot.lane.b32.xlu1 %v2166_v18, %s3674_s23 }
0x2251   :  { %2172 = vrot.lane.b32.xlu0 %v2167_v30, %s3674_s23 }
0x22c2   :  { %v2171_v36 = vpop.permute.xlu1 %2170 }
0x22c3   :  { %v2173_v37 = vpop.permute.xlu0 %2172  ;;  %v4309_v39 = vadd.f32 %v2171_v36, %v2156_v33 }
0x22c4   :  { %v4311_v44 = vadd.f32 %v2173_v37, %v2157_v34 }
0x22c5   :  { %3405 = vtanh.f32 %v4309_v39  ;;  %v2294_v23 = vrot.slane %v4309_v39, 7 }
0x22c6   :  { %3407 = vtanh.f32 %v4311_v44  ;;  %v2295_v24 = vrot.slane %v4311_v44, 7 }
0x22d2   :  { %v3406_v45 = vpop.eup %3405 }
0x22d3   :  { %v3408_v48 = vpop.eup %3407  ;;  %2182 = vrot.lane.b32.xlu1 %v3406_v45, %s3682_s0 }
0x22d4   :  { %2184 = vrot.lane.b32.xlu0 %v3408_v48, %s3682_s0 }
0x2345   :  { %v2183_v51 = vpop.permute.xlu1 %2182 }
0x2346   :  { %v2185_v52 = vpop.permute.xlu0 %2184  ;;  %v2188_v53 = vmul.f32 %v3402_v14, %v2183_v51 }
0x2347   :  { %v2189_v54 = vmul.f32 %v3404_v12, %v2185_v52 }
0x2348   :  { %v2192_v1 = vrot.slane %v2188_v53, 4  ;;  %v4319_v55 = vsel %vm1372_vm7, %v4281_v7, %v2188_v53 }
0x2349   :  { %v2193_v3 = vrot.slane %v2189_v54, 3  ;;  %v4323_v58 = vsel %vm1372_vm7, %v4285_v10, %v2189_v54 }
0x234b   :  { %v2194_v6 = vsel %vm374_vm3, %v2193_v3, %v2192_v1 }
0x234c   :  { %2195 = vrot.lane.b32.xlu1 %v2194_v6, %s3674_s23 }
0x23be   :  { %v2196_v59 = vpop.permute.xlu1 %2195 }
0x23bf   :  { %3148 = vmatmul.mubr.msk.f32.vlgmr.msra.gmra.mxu1 %vm227_vm2, %v2196_v59 }
0x23c0   :  { %3162 = vmatpush3.msra.mxu1 %v4096_v42  ;;  %3169 = vmatprep.mubr.msk.f32.mxu1 %vm3681_vm0, %v3680_v0 }
0x23c1   :  { %3163 = vmatprep.subr.mxu1 %v3680_v0 }
0x23c2   :  { %3164 = vmatpush3.msra.mxu1 %v4098_v43 }
0x23c3   :  { %3165 = vmatprep.subr.mxu1 %v3680_v0 }
0x23c4   :  { %3166 = vmatpush3.msra.mxu1 %v4102_v46 }
0x23c5   :  { %3167 = vmatprep.subr.mxu1 %v3680_v0 }
0x23c6   :  { %3168 = vmatpush3.msra.mxu1 %v4106_v49 }
0x247f   :  { %v2265_v9 = vpop.f32.mrf.mxu1 }
0x2480   :  { %v2270_v60 = vrot.slane %v2265_v9, 3  ;;  %v2271_v61 = vrot.slane %v2265_v9, 4 }
0x2481   :  { %v3149_v2 = vpop.f32.mrf.mxu1 }
0x2482   :  { %v2274_v42 = vadd.f32 %v2270_v60, %v4155_v4  ;;  %v2275_v5 = vadd.f32 %v4150_v62, %v2271_v61 }
0x2484   :  { %v2276_v7 = vadd.f32 %v4152_v63, %v2274_v42  ;;  %v2277_v43 = vadd.f32 %v4152_v63, %v2275_v5 }
0x2486   :  { %3409 = vtanh.f32 %v2276_v7  ;;  %v2871_v0 = vmul.f32 -1.442695, %v2276_v7  ;;  %v2872_v49 = vmul.f32 -1.442695, %v2277_v43 }
0x2487   :  { %3411 = vtanh.f32 %v2277_v43 }
0x2488   :  { %3413 = vpow2.f32 %v2871_v0 }
0x2489   :  { %3415 = vpow2.f32 %v2872_v49 }
0x2493   :  { %v3410_v8 = vpop.eup %3409 }
0x2494   :  { %v3412_v46 = vpop.eup %3411  ;;  %2302 = vrot.lane.b32.xlu0 %v3410_v8, %s3682_s0 }
0x2495   :  { %2304 = vrot.lane.b32.xlu1 %v3412_v46, %s3682_s0  ;;  %v3414_v10 = vpop.eup %3413 }
0x2496   :  { %v3416_v11 = vpop.eup %3415  ;;  %v2284_v13 = vadd.f32 1.0, %v3414_v10 }
0x2497   :  { %v2285_v15 = vadd.f32 1.0, %v3416_v11 }
0x2498   :  { %3417 = vrcp.f32 %v2284_v13 }
0x2499   :  { %3419 = vrcp.f32 %v2285_v15 }
0x24a5   :  { %v3418_v16 = vpop.eup %3417 }
0x24a6   :  { %v3420_v19 = vpop.eup %3419  ;;  %v2298_v47 = vmul.f32 %v3418_v16, %v2294_v23 }
0x24a7   :  { %v2299_v35 = vmul.f32 %v3420_v19, %v2295_v24 }
0x2506   :  { %v2303_v17 = vpop.permute.xlu0 %2302 }
0x2507   :  { %v2305_v20 = vpop.permute.xlu1 %2304  ;;  %v2308_v21 = vmul.f32 %v3418_v16, %v2303_v17 }
0x2508   :  { %v2309_v22 = vmul.f32 %v3420_v19, %v2305_v20 }
0x2509   :  { %2312 = vrot.lane.b32.xlu0 %v2308_v21, %s3674_s23 }
0x250a   :  { %2314 = vrot.lane.b32.xlu1 %v2309_v22, %s3674_s23 }
0x257b   :  { %v2313_v38 = vpop.permute.xlu0 %2312 }
0x257c   :  { %v2315_v50 = vpop.permute.xlu1 %2314  ;;  %v2318_v25 = vadd.f32 %v2313_v38, %v2298_v47 }
0x257d   :  { %v2319_v26 = vadd.f32 %v2315_v50, %v2299_v35 }
0x257e   :  { %3421 = vtanh.f32 %v2318_v25  ;;  %v2436_v43 = vrot.slane %v2318_v25, 7 }
0x257f   :  { %3423 = vtanh.f32 %v2319_v26  ;;  %v2437_v8 = vrot.slane %v2319_v26, 7 }
0x258b   :  { %v3422_v27 = vpop.eup %3421 }
0x258c   :  { %v3424_v14 = vpop.eup %3423  ;;  %2324 = vrot.lane.b32.xlu0 %v3422_v27, %s3682_s0 }
0x258d   :  { %2326 = vrot.lane.b32.xlu1 %v3424_v14, %s3682_s0 }
0x25fe   :  { %v2325_v28 = vpop.permute.xlu0 %2324 }
0x25ff   :  { %v2327_v12 = vpop.permute.xlu1 %2326  ;;  %v2330_v29 = vmul.f32 %v3418_v16, %v2325_v28 }
0x2600   :  { %v2331_v18 = vmul.f32 %v3420_v19, %v2327_v12 }
0x2601   :  { %v2334_v30 = vrot.slane %v2330_v29, 5  ;;  %v2624_v31 = vsel %vm1375_vm8, %v4319_v55, %v2330_v29 }
0x2602   :  { %v2335_v32 = vrot.slane %v2331_v18, 4  ;;  %v2625_v33 = vsel %vm1375_vm8, %v4323_v58, %v2331_v18 }
0x2604   :  { %v2336_v34 = vsel %vm374_vm3, %v2335_v32, %v2334_v30 }
0x2605   :  { %2337 = vrot.lane.b32.xlu0 %v2336_v34, %s3674_s23 }
0x2677   :  { %v2338_v36 = vpop.permute.xlu0 %2337 }
0x2678   :  { %3159 = vmatmul.mubr.msk.f32.vlgmr.msra.gmra.mxu0 %vm227_vm2, %v2338_v36 }
0x2738   :  { %v2407_v37 = vpop.f32.mrf.mxu0 }
0x2739   :  { %v2412_v39 = vrot.slane %v2407_v37, 2  ;;  %v2413_v44 = vrot.slane %v2407_v37, 3 }
0x273a   :  { %v3160_v45 = vpop.f32.mrf.mxu0 }
0x273b   :  { %v2416_v48 = vadd.f32 %v2412_v39, %v4155_v4  ;;  %v2417_v51 = vadd.f32 %v4150_v62, %v2413_v44 }
0x273d   :  { %v2418_v52 = vadd.f32 %v4152_v63, %v2416_v48  ;;  %v2419_v53 = vadd.f32 %v4152_v63, %v2417_v51 }
0x273f   :  { %3425 = vtanh.f32 %v2418_v52  ;;  %v2874_v55 = vmul.f32 -1.442695, %v2418_v52  ;;  %v2875_v3 = vmul.f32 -1.442695, %v2419_v53 }
0x2740   :  { %3427 = vtanh.f32 %v2419_v53 }
0x2741   :  { %3429 = vpow2.f32 %v2874_v55 }
0x2742   :  { %3431 = vpow2.f32 %v2875_v3 }
0x274c   :  { %v3426_v54 = vpop.eup %3425 }
0x274d   :  { %v3428_v1 = vpop.eup %3427  ;;  %2444 = vrot.lane.b32.xlu1 %v3426_v54, %s3682_s0 }
0x274e   :  { %2446 = vrot.lane.b32.xlu0 %v3428_v1, %s3682_s0  ;;  %v3430_v58 = vpop.eup %3429 }
0x274f   :  { %v3432_v6 = vpop.eup %3431  ;;  %v2426_v59 = vadd.f32 1.0, %v3430_v58 }
0x2750   :  { %v2427_v9 = vadd.f32 1.0, %v3432_v6 }
0x2751   :  { %3433 = vrcp.f32 %v2426_v59  ;;  %v2633_v59 = vld [vmem:[%s4451_s7 + $0x18] sm:$0xff] }
0x2752   :  { %3435 = vrcp.f32 %v2427_v9  ;;  %v2632_v9 = vld [vmem:[%s4451_s7 + $0x10] sm:$0xff]  ;;  %3172 = vmatprep.subr.mxu0 %v2633_v59 }
0x2753   :  { %3173 = vmatpush3.msra.mxu0 %v2633_v59 }
0x2754   :  { %3174 = vmatprep.subr.mxu0 %v2632_v9 }
0x2755   :  { %3175 = vmatpush3.msra.mxu0 %v2632_v9 }
0x275e   :  { %v3434_v60 = vpop.eup %3433 }
0x275f   :  { %v3436_v2 = vpop.eup %3435  ;;  %v2440_v46 = vmul.f32 %v3434_v60, %v2436_v43 }
0x2760   :  { %v2441_v0 = vmul.f32 %v3436_v2, %v2437_v8 }
0x27bf   :  { %v2445_v61 = vpop.permute.xlu1 %2444 }
0x27c0   :  { %v2447_v42 = vpop.permute.xlu0 %2446  ;;  %v2450_v5 = vmul.f32 %v3434_v60, %v2445_v61  ;;  %v2630_v61 = vld [vmem:[%s4451_s7] sm:$0xff] }
0x27c1   :  { %v2451_v7 = vmul.f32 %v3436_v2, %v2447_v42 }
0x27c2   :  { %2454 = vrot.lane.b32.xlu1 %v2450_v5, %s3674_s23 }
0x27c3   :  { %2456 = vrot.lane.b32.xlu0 %v2451_v7, %s3674_s23 }
0x2834   :  { %v2455_v49 = vpop.permute.xlu1 %2454 }
0x2835   :  { %v2457_v10 = vpop.permute.xlu0 %2456  ;;  %v2460_v11 = vadd.f32 %v2455_v49, %v2440_v46  ;;  %v2732_v46 = vrot.slane %v4128_v57, 7 }
0x2836   :  { %v2461_v13 = vadd.f32 %v2457_v10, %v2441_v0  ;;  %v2756_v0 = vrot.slane %v4092_v41, 7 }
0x2837   :  { %3437 = vtanh.f32 %v2460_v11  ;;  %v2578_v48 = vrot.slane %v2460_v11, 7 }
0x2838   :  { %3439 = vtanh.f32 %v2461_v13  ;;  %v2579_v51 = vrot.slane %v2461_v13, 7 }
0x2844   :  { %v3438_v15 = vpop.eup %3437 }
0x2845   :  { %v3440_v16 = vpop.eup %3439  ;;  %2466 = vrot.lane.b32.xlu1 %v3438_v15, %s3682_s0 }
0x2846   :  { %2468 = vrot.lane.b32.xlu0 %v3440_v16, %s3682_s0 }
0x28b7   :  { %v2467_v17 = vpop.permute.xlu1 %2466 }
0x28b8   :  { %v2469_v19 = vpop.permute.xlu0 %2468  ;;  %v2472_v20 = vmul.f32 %v3434_v60, %v2467_v17  ;;  %v2631_v60 = vld [vmem:[%s4451_s7 + $0x8] sm:$0xff]  ;;  %s3683_s7 = smov 96  }
0x28b9   :  { %v2473_v21 = vmul.f32 %v3436_v2, %v2469_v19  ;;  %3176 = vmatprep.subr.mxu0 %v2631_v60 }
0x28ba   :  { %v2476_v22 = vrot.slane %v2472_v20, 6  ;;  %v4367_v23 = vsel %vm1378_vm9, %v2624_v31, %v2472_v20  ;;  %3177 = vmatpush3.msra.mxu0 %v2631_v60 }
0x28bb   :  { %v2477_v24 = vrot.slane %v2473_v21, 5  ;;  %v4370_v47 = vsel %vm1378_vm9, %v2625_v33, %v2473_v21  ;;  %3178 = vmatprep.subr.mxu0 %v2630_v61 }
0x28bc   :  { %3179 = vmatpush3.msra.mxu0 %v2630_v61 }
0x28bd   :  { %v2478_v35 = vsel %vm374_vm3, %v2477_v24, %v2476_v22 }
0x28be   :  { %2479 = vrot.lane.b32.xlu1 %v2478_v35, %s3674_s23 }
0x2930   :  { %v2480_v38 = vpop.permute.xlu1 %2479 }
0x2931   :  { %3170 = vmatmul.mubr.msk.f32.vlgmr.msra.gmra.mxu1 %vm227_vm2, %v2480_v38 }
0x29f1   :  { %v2549_v50 = vpop.f32.mrf.mxu1 }
0x29f2   :  { %v2554_v25 = vrot.slane %v2549_v50, 1  ;;  %v2555_v26 = vrot.slane %v2549_v50, 2 }
0x29f3   :  { %v3171_v27 = vpop.f32.mrf.mxu1 }
0x29f4   :  { %v2558_v14 = vadd.f32 %v2554_v25, %v4155_v4  ;;  %v2559_v28 = vadd.f32 %v4150_v62, %v2555_v26 }
0x29f6   :  { %v2560_v12 = vadd.f32 %v4152_v63, %v2558_v14  ;;  %v2561_v29 = vadd.f32 %v4152_v63, %v2559_v28 }
0x29f8   :  { %3441 = vtanh.f32 %v2560_v12  ;;  %v2877_v31 = vmul.f32 -1.442695, %v2560_v12  ;;  %v2878_v32 = vmul.f32 -1.442695, %v2561_v29 }
0x29f9   :  { %3443 = vtanh.f32 %v2561_v29 }
0x29fa   :  { %3445 = vpow2.f32 %v2877_v31 }
0x29fb   :  { %3447 = vpow2.f32 %v2878_v32 }
0x2a05   :  { %v3442_v18 = vpop.eup %3441 }
0x2a06   :  { %v3444_v30 = vpop.eup %3443  ;;  %2586 = vrot.lane.b32.xlu0 %v3442_v18, %s3682_s0 }
0x2a07   :  { %2588 = vrot.lane.b32.xlu1 %v3444_v30, %s3682_s0  ;;  %v3446_v33 = vpop.eup %3445 }
0x2a08   :  { %v3448_v4 = vpop.eup %3447  ;;  %v2568_v34 = vadd.f32 1.0, %v3446_v33 }
0x2a09   :  { %v2569_v62 = vadd.f32 1.0, %v3448_v4 }
0x2a0a   :  { %3449 = vrcp.f32 %v2568_v34 }
0x2a0b   :  { %3451 = vrcp.f32 %v2569_v62 }
0x2a17   :  { %v3450_v36 = vpop.eup %3449 }
0x2a18   :  { %v3452_v37 = vpop.eup %3451  ;;  %v2582_v52 = vmul.f32 %v3450_v36, %v2578_v48 }
0x2a19   :  { %v2583_v53 = vmul.f32 %v3452_v37, %v2579_v51 }
0x2a78   :  { %v2587_v63 = vpop.permute.xlu0 %2586 }
0x2a79   :  { %v2589_v39 = vpop.permute.xlu1 %2588  ;;  %v2592_v44 = vmul.f32 %v3450_v36, %v2587_v63 }
0x2a7a   :  { %v2593_v45 = vmul.f32 %v3452_v37, %v2589_v39 }
0x2a7b   :  { %2596 = vrot.lane.b32.xlu0 %v2592_v44, %s3674_s23 }
0x2a7c   :  { %2598 = vrot.lane.b32.xlu1 %v2593_v45, %s3674_s23 }
0x2aed   :  { %v2597_v54 = vpop.permute.xlu0 %2596 }
0x2aee   :  { %v2599_v1 = vpop.permute.xlu1 %2598  ;;  %v2602_v55 = vadd.f32 %v2597_v54, %v2582_v52 }
0x2aef   :  { %v2603_v3 = vadd.f32 %v2599_v1, %v2583_v53 }
0x2af0   :  { %3453 = vtanh.f32 %v2602_v55 }
0x2af1   :  { %3455 = vtanh.f32 %v2603_v3  ;;  %v2757_v10 = vrot.slane %v2603_v3, 7 }
0x2afd   :  { %v3454_v58 = vpop.eup %3453 }
0x2afe   :  { %v3456_v6 = vpop.eup %3455  ;;  %2608 = vrot.lane.b32.xlu0 %v3454_v58, %s3682_s0 }
0x2aff   :  { %2610 = vrot.lane.b32.xlu1 %v3456_v6, %s3682_s0 }
0x2b70   :  { %v2609_v2 = vpop.permute.xlu0 %2608 }
0x2b71   :  { %v2611_v42 = vpop.permute.xlu1 %2610  ;;  %v2614_v5 = vmul.f32 %v3450_v36, %v2609_v2 }
0x2b72   :  { %v2615_v7 = vmul.f32 %v3452_v37, %v2611_v42 }
0x2b73   :  { %v2628_v43 = vsel %vm1381_vm10, %v4367_v23, %v2614_v5 }
0x2b74   :  { %v2629_v8 = vsel %vm1381_vm10, %v4370_v47, %v2615_v7  ;;  %2643 = vrot.lane.b32.xlu0 %v2628_v43, %s3674_s23  ;;  %v2733_v49 = vrot.slane %v2615_v7, 7 }
0x2b75   :  { %2645 = vrot.lane.b32.xlu1 %v2629_v8, %s3674_s23 }
0x2b78   :  { %2734 = vrot.lane.b32.xlu0 %v4126_v56, %s3674_s23 }
0x2b79   :  { %2736 = vrot.lane.b32.xlu1 %v2732_v46, %s3674_s23 }
0x2b7c   :  { %2738 = vrot.lane.b32.xlu0 %v2614_v5, %s3674_s23 }
0x2b7d   :  { %2760 = vrot.lane.b32.xlu1 %v2756_v0, %s3683_s7 }
0x2b80   :  { %2758 = vrot.lane.b32.xlu0 %v4090_v40, %s3683_s7 }
0x2b81   :  { %2740 = vrot.lane.b32.xlu1 %v2733_v49, %s3674_s23 }
0x2b84   :  { %2762 = vrot.lane.b32.xlu0 %v2602_v55, %s3683_s7 }
0x2b85   :  { %2764 = vrot.lane.b32.xlu1 %v2757_v10, %s3683_s7 }
0x2be6   :  { %v2644_v57 = vpop.permute.xlu0 %2643 }
0x2be7   :  { %v2646_v11 = vpop.permute.xlu1 %2645  ;;  %3180 = vmatprep.mubr.msk.f32.mxu0 %vm227_vm2, %v2644_v57 }
0x2be8   :  { %3181 = vmatmul.mubr.msk.f32.vlgmr.msra.gmra.mxu0 %vm227_vm2, %v2646_v11 }
0x2bea   :  { %v2735_v41 = vpop.permute.xlu0 %2734 }
0x2beb   :  { %v2737_v56 = vpop.permute.xlu1 %2736  ;;  %2747 = vst.msk [vmem:[#allocation15 - $0x7] sm:$0x80] %vm2746_vm11, %v2735_v41 }
0x2bec   :  { %2749 = vst.msk [vmem:[#allocation15 + $0x1] sm:$0x1] %vm2748_vm12, %v2737_v56 }
0x2bee   :  { %v2739_v40 = vpop.permute.xlu0 %2738 }
0x2bef   :  { %v2761_v13 = vpop.permute.xlu1 %2760  ;;  %2750 = vst.msk [vmem:[#allocation15 - $0x5] sm:$0x80] %vm2746_vm11, %v2739_v40 }
0x2bf0   :  { %2771 = vst.msk [vmem:[#allocation17 + $0x1] sm:$0x1] %vm2748_vm12, %v2761_v13 }
0x2bf2   :  { %v2759_v15 = vpop.permute.xlu0 %2758 }
0x2bf3   :  { %v2741_v16 = vpop.permute.xlu1 %2740  ;;  %2770 = vst.msk [vmem:[#allocation17 - $0x7] sm:$0x80] %vm2746_vm11, %v2759_v15 }
0x2bf4   :  { %2751 = vst.msk [vmem:[#allocation15 + $0x3] sm:$0x1] %vm2748_vm12, %v2741_v16 }
0x2bf6   :  { %v2763_v17 = vpop.permute.xlu0 %2762 }
0x2bf7   :  { %v2765_v19 = vpop.permute.xlu1 %2764  ;;  %2772 = vst.msk [vmem:[#allocation17 - $0x5] sm:$0x80] %vm2746_vm11, %v2763_v17 }
0x2bf8   :  { %2773 = vst.msk [vmem:[#allocation17 + $0x3] sm:$0x1] %vm2748_vm12, %v2765_v19 }
0x2bf9   :  { %3608 = shalt.err (!%p3605_p11)
}
0x2bfa   :  { %2797 = dma.vmem_to_hbm [thread:$0]  %s2792_s6, 64, %s4456_s12, [#allocation16], %s3674_s23, %s3674_s23, %s3675_s24  }
0x2bfb   :  { %s3685_s14 = smov [#allocation17]  }
0x2bfc   :  { %s2803_s15 = sshll.u32 %s3685_s14, 4  ;;  %s2804_s15 = int_to_ptr.vmem [resolvable:$true] %s2803_s15 }
0x2bfd   :  { %s3617_s9 = scalar_lea.vmem %s2804_s15, 64  ;;  %p3622_p13 = scmp.lt.s32.totalorder %s2804_s15, %s2804_s15 }
0x2bfe   :  { %p3618_p12 = scmp.ne.s32.totalorder %s2804_s15, %s3617_s9  ;;  %p3623_p0 = scmp.lt.s32.totalorder %s3617_s9, %s3617_s9 }
0x2c00   :  { %p3624_p1 = por %p3623_p0, %p3622_p13 }
0x2c02   :  { %p3625_p2 = pnand %p3624_p1, %p3618_p12 }
0x2c04   :  { %3628 = shalt.err (!%p3625_p2)
}
0x2c05   :  { %2809 = dma.vmem_to_hbm [thread:$0]  %s2804_s15, 64, %s4457_s13, [#allocation16], %s3674_s23, %s3674_s23, %s3675_s24  }
0x2c06   :  { %v2879_v20 = vld [vmem:[%s4452_s8] ss:$0 sm:$0xff]  ;;  %s3686_s12 = smov [#allocation14]  }
0x2c07   :  { %s2779_s22 = sshll.u32 %s3686_s12, 4  ;;  %s2780_s22 = int_to_ptr.vmem [resolvable:$true] %s2779_s22 }
0x2c08   :  { %s3637_s0 = scalar_lea.vmem %s2780_s22, 256  ;;  %p3642_p4 = scmp.lt.s32.totalorder %s2780_s22, %s2780_s22 }
0x2c09   :  { %p3638_p3 = scmp.ne.s32.totalorder %s2780_s22, %s3637_s0  ;;  %p3643_p5 = scmp.lt.s32.totalorder %s3637_s0, %s3637_s0 }
0x2c0b   :  { %p3644_p6 = por %p3643_p5, %p3642_p4 }
0x2c0d   :  { %p3645_p7 = pnand %p3644_p6, %p3638_p3 }
0x2ca8   :  { %v3182_v21 = vpop.f32.mrf.mxu0 }
0x2ca9   :  { %v2723_v22 = vadd.f32 %v3182_v21, %v2879_v20 }
0x2caa   :  { %v2717_v23 = vpop.f32.mrf.mxu0 }
0x2cab   :  { %2727 = vst.msk [vmem:[#allocation14 + $0x8] sm:$0xff] %vm138_vm1, %v2723_v22  ;;  %v2718_v24 = vadd.f32 %v2879_v20, %v2717_v23 }
0x2cad   :  { %2726 = vst.msk [vmem:[#allocation14] sm:$0xff] %vm138_vm1, %v2718_v24 }
0x2cae   :  { %3648 = shalt.err (!%p3645_p7)
}
0x2caf   :  { %2785 = dma.vmem_to_hbm [thread:$0]  %s2780_s22, 256, %s4455_s11, [#allocation4], %s3672_s19, %s3672_s19, %s3673_s20  }
0x2cb0   :  { %3665 = dma.done.wait [#allocation4], 256  }
0x2cb1   :  { %3666 = vsyncadd [#allocation4], 4294967040 }
0x2cb2   :  { %3667 = dma.done.wait [#allocation16], 128  }
0x2cb3   :  { %3668 = vsyncadd [#allocation16], 4294967168 }
0x2cb4   :  { %2819 = vsyncpa [#allocation3], 1 }
0x2cb5   :  { %2820 = vsyncpa [#allocation6], 1 }
0x2cb6   :  { %2821 = vsyncpa [#allocation9], 1 }
0x2cb7   :  { %2822 = vsyncpa [#allocation12], 1 }
0x2cb8   :  { %2823 = vsyncpa [#allocation4], 1 }
0x2cb9   :  { %2824 = vsyncpa [#allocation16], 1 }

</bundles_post_ra>
